<compile_context>
chip_gen: v7x
topology: tpu7x:2x2x1
jax: 0.10.0
libtpu: 0.0.40
codegen_flags: <defaults>
</compile_context>

<pallas_src>
import math

import jax
import jax.numpy as jnp
from jax import lax
from jax.experimental import pallas as pl
from jax.experimental.pallas import tpu as pltpu


def _round_up(x, m):
    return (x + m - 1) // m * m


# ---------------------------------------------------------------------------
# Pallas kernel: GRU stack.  grid = (batch_tiles, num_layers).
# ---------------------------------------------------------------------------
def gru_stack_kernel(x_ref, pos_ref, w_ih_ref, w_hh_ref, b_ih_ref, b_hh_ref,
                     out_ref, hid_ref,
                     gi_ref, h_ref):
    # x_ref   : (T, TB, Ep)   embedded tokens, this batch tile, time-major
    # pos_ref : (T, Ep)       positional-encoding table (padded)
    # w_ih_ref: (1, Ep, 3Hp)  pre-transposed, gate-blocked input weights
    # w_hh_ref: (1, Hp, 3Hp)  pre-transposed, gate-blocked hidden weights
    # b_ih_ref: (1, 1, 3Hp)
    # b_hh_ref: (1, 1, 3Hp)
    # out_ref : (T, TB, Hp)   resident across the layer axis; doubles as the
    #                         running per-layer sequence buffer
    # hid_ref : (1, TB, Hp)   final hidden state of this layer
    # gi_ref  : (T, TB, 3Hp)  scratch: hoisted input projection
    # h_ref   : (TB, Hp)      scratch: hidden state
    layer = pl.program_id(1)
    T, TB, Hp = out_ref.shape
    G = 3 * Hp

    @pl.when(layer == 0)
    def _():
        # PositionalEncoding: inputs + pos  (Dropout = identity in eval mode)
        out_ref[...] = x_ref[...] + pos_ref[...][:, None, :]

    # h0 = zeros (PyTorch GRU default initial hidden state)
    h_ref[...] = jnp.zeros_like(h_ref)

    w_ih = w_ih_ref[0]                                     # (Ep, 3Hp)
    w_hh = w_hh_ref[0]                                     # (Hp, 3Hp)
    b_ih = jnp.broadcast_to(b_ih_ref[0], (T * TB, G))      # hoisted broadcasts
    b_hh = jnp.broadcast_to(b_hh_ref[0], (TB, G))

    # Hoisted input projection: one (T*TB, Ep) x (Ep, 3Hp) MXU matmul per layer
    # (T*TB rows in the sublane dim) instead of T tiny matmuls on the serial
    # critical path.
    seq_flat = out_ref[...].reshape(T * TB, Hp)            # requires E == H
    gi_all = jnp.dot(seq_flat, w_ih, preferred_element_type=jnp.float32) + b_ih
    gi_ref[...] = gi_all.reshape(T, TB, G)

    def step(t, carry):
        h_prev = h_ref[...]                                # (TB, Hp)
        gi = gi_ref[t]                                     # (TB, 3Hp)
        gh = jnp.dot(h_prev, w_hh, preferred_element_type=jnp.float32) + b_hh
        # PyTorch GRU gate order: r, z, n; each gate is a full 128-lane tile.
        r = jax.nn.sigmoid(gi[:, 0:Hp] + gh[:, 0:Hp])
        z = jax.nn.sigmoid(gi[:, Hp:2 * Hp] + gh[:, Hp:2 * Hp])
        n = jnp.tanh(gi[:, 2 * Hp:3 * Hp] + r * gh[:, 2 * Hp:3 * Hp])
        h_new = (1.0 - z) * n + z * h_prev
        h_ref[...] = h_new
        out_ref[t] = h_new                                 # this layer's output at time t
        return carry

    # Unrolled so MXU push / EUP / VPU work from adjacent timesteps interleaves.
    lax.fori_loop(0, T, step, 0, unroll=True)

    hid_ref[0] = h_ref[...]
    # No epilogue copy: out_ref already holds the last layer's sequence when the
    # layer window ends and Pallas writes it back.


# ---------------------------------------------------------------------------
# Parameters (mirroring the PyTorch module shapes)
# ---------------------------------------------------------------------------
def make_params(key, num_embeddings, embedding_size, max_length, num_layers):
    E = embedding_size
    H = embedding_size
    keys = jax.random.split(key, 1 + 4 * num_layers)

    # nn.Embedding: weight ~ N(0, 1)
    emb_table = jax.random.normal(keys[0], (num_embeddings, E), dtype=jnp.float32)

    # PositionalEncoding buffer (max_length, E)
    span = jnp.arange(max_length, dtype=jnp.float32)[:, None]
    x = jnp.arange(E // 2, dtype=jnp.float32)
    div_term = jnp.exp(x * (-math.log(10000.0) / E))
    pos = jnp.zeros((max_length, E), dtype=jnp.float32)
    pos = pos.at[:, 0::2].set(jnp.sin(span * div_term))
    pos = pos.at[:, 1::2].set(jnp.cos(span * div_term))

    # nn.GRU: uniform(-1/sqrt(H), 1/sqrt(H)); input_size == hidden_size == E
    k = 1.0 / math.sqrt(H)
    w_ih, w_hh, b_ih, b_hh = [], [], [], []
    for l in range(num_layers):
        w_ih.append(jax.random.uniform(keys[1 + 4 * l], (3 * H, E), jnp.float32, -k, k))
        w_hh.append(jax.random.uniform(keys[2 + 4 * l], (3 * H, H), jnp.float32, -k, k))
        b_ih.append(jax.random.uniform(keys[3 + 4 * l], (3 * H,), jnp.float32, -k, k))
        b_hh.append(jax.random.uniform(keys[4 + 4 * l], (3 * H,), jnp.float32, -k, k))
    return dict(
        emb_table=emb_table,
        pos=pos,
        w_ih=jnp.stack(w_ih),   # (L, 3H, E)
        w_hh=jnp.stack(w_hh),   # (L, 3H, H)
        b_ih=jnp.stack(b_ih),   # (L, 3H)
        b_hh=jnp.stack(b_hh),   # (L, 3H)
    )


# ---------------------------------------------------------------------------
# Wrapper
# ---------------------------------------------------------------------------
def encoder_forward(token_ids, params, *, batch_tile=8):
    """token_ids: (B, T) int32. Returns (rnn (B,T,E), hidden (L,B,E))."""
    emb_table = params["emb_table"]
    pos = params["pos"]
    L, threeH, E = params["w_ih"].shape
    H = threeH // 3
    assert E == H, "encoder assumes input_size == hidden_size (embedding_size)"
    B, T = token_ids.shape
    assert pos.shape[0] == T, "sequence length must equal max_length for the pos add"

    # Lane/sublane-dense padded sizes.
    Hp = _round_up(H, 128)           # lane-dense hidden / gate width
    Ep = Hp                          # E == H  =>  Ep == Hp
    TB = batch_tile                  # sublane-dense batch tile (multiple of 8)
    Bp = _round_up(B, TB)

    # glue: embedding gather, pad batch/feature, time-major layout
    emb = emb_table[token_ids]                                        # (B, T, E)
    x_p = jnp.zeros((Bp, T, Ep), jnp.float32).at[:B, :, :E].set(emb)  # (Bp, T, Ep)
    x_tm = jnp.transpose(x_p, (1, 0, 2))                              # (T, Bp, Ep)
    pos_p = jnp.zeros((T, Ep), jnp.float32).at[:, :E].set(pos)        # (T, Ep)

    # glue: pad + pre-transpose GRU weights so each gate occupies its own
    # 128-lane block of the 3Hp output dim (gate g lives at [g*Hp : (g+1)*Hp]).
    w_ih_t = jnp.transpose(params["w_ih"].reshape(L, 3, H, E), (0, 3, 1, 2))   # (L,E,3,H)
    w_hh_t = jnp.transpose(params["w_hh"].reshape(L, 3, H, H), (0, 3, 1, 2))   # (L,H,3,H)
    w_ih_p = (jnp.zeros((L, Ep, 3, Hp), jnp.float32)
              .at[:, :E, :, :H].set(w_ih_t).reshape(L, Ep, 3 * Hp))
    w_hh_p = (jnp.zeros((L, Hp, 3, Hp), jnp.float32)
              .at[:, :H, :, :H].set(w_hh_t).reshape(L, Hp, 3 * Hp))
    b_ih_p = (jnp.zeros((L, 1, 3, Hp), jnp.float32)
              .at[:, :, :, :H].set(params["b_ih"].reshape(L, 1, 3, H)).reshape(L, 1, 3 * Hp))
    b_hh_p = (jnp.zeros((L, 1, 3, Hp), jnp.float32)
              .at[:, :, :, :H].set(params["b_hh"].reshape(L, 1, 3, H)).reshape(L, 1, 3 * Hp))

    num_btiles = Bp // TB

    out_tm_p, hidden_p = pl.pallas_call(
        gru_stack_kernel,
        out_shape=(
            jax.ShapeDtypeStruct((T, Bp, Hp), jnp.float32),   # last-layer sequence (time-major, padded)
            jax.ShapeDtypeStruct((L, Bp, Hp), jnp.float32),   # final hidden per layer (padded)
        ),
        grid_spec=pltpu.PrefetchScalarGridSpec(
            num_scalar_prefetch=0,
            grid=(num_btiles, L),                              # batch tiles parallel, layers sequential
            in_specs=[
                pl.BlockSpec((T, TB, Ep), lambda b, l: (0, b, 0)),      # x (time-major, this batch tile)
                pl.BlockSpec((T, Ep), lambda b, l: (0, 0)),             # positional encoding
                pl.BlockSpec((1, Ep, 3 * Hp), lambda b, l: (l, 0, 0)),  # w_ih_t for layer l
                pl.BlockSpec((1, Hp, 3 * Hp), lambda b, l: (l, 0, 0)),  # w_hh_t for layer l
                pl.BlockSpec((1, 1, 3 * Hp), lambda b, l: (l, 0, 0)),   # b_ih
                pl.BlockSpec((1, 1, 3 * Hp), lambda b, l: (l, 0, 0)),   # b_hh
            ],
            out_specs=[
                pl.BlockSpec((T, TB, Hp), lambda b, l: (0, b, 0)),      # resident over layers: layer buffer
                pl.BlockSpec((1, TB, Hp), lambda b, l: (l, b, 0)),      # hidden per layer / batch tile
            ],
            scratch_shapes=[
                pltpu.VMEM((T, TB, 3 * Hp), jnp.float32),               # hoisted input projection
                pltpu.VMEM((TB, Hp), jnp.float32),                      # hidden state
            ],
        ),
        compiler_params=pltpu.CompilerParams(
            dimension_semantics=("parallel", "arbitrary"),              # batch || (v7x 2 TCs), layers serial
            vmem_limit_bytes=64 * 1024 * 1024,
        ),
    )(x_tm, pos_p, w_ih_p, w_hh_p, b_ih_p, b_hh_p)

    rnn = jnp.transpose(out_tm_p[:, :B, :H], (1, 0, 2))   # back to batch_first (B, T, H)
    hidden = hidden_p[:, :B, :H]
    # final Dropout = identity (eval mode)
    return rnn, hidden


# ---------------------------------------------------------------------------
# Pure-JAX reference (for a loose numerical self-check)
# ---------------------------------------------------------------------------
def encoder_reference(token_ids, params):
    emb = params["emb_table"][token_ids]                 # (B, T, E)
    x = emb + params["pos"][None, :, :]                  # PositionalEncoding (dropout=identity)
    L, threeH, _ = params["w_ih"].shape
    H = threeH // 3
    seq = x
    hs = []
    for l in range(L):
        w_ih, w_hh = params["w_ih"][l], params["w_hh"][l]
        b_ih, b_hh = params["b_ih"][l], params["b_hh"][l]

        def step(h, x_t):
            gi = x_t @ w_ih.T + b_ih
            gh = h @ w_hh.T + b_hh
            r = jax.nn.sigmoid(gi[:, :H] + gh[:, :H])
            z = jax.nn.sigmoid(gi[:, H:2 * H] + gh[:, H:2 * H])
            n = jnp.tanh(gi[:, 2 * H:] + r * gh[:, 2 * H:])
            h_new = (1.0 - z) * n + z * h
            return h_new, h_new

        h0 = jnp.zeros((seq.shape[0], H), jnp.float32)
        h_last, ys = lax.scan(step, h0, jnp.transpose(seq, (1, 0, 2)))
        seq = jnp.transpose(ys, (1, 0, 2))
        hs.append(h_last)
    return seq, jnp.stack(hs)


if __name__ == "__main__":
    # small shapes consistent with the module
    num_embeddings = 16
    embedding_size = 32
    max_length = 8            # seq len must equal max_length (pos add requires it)
    num_layers = 2
    batch = 2

    key = jax.random.PRNGKey(0)
    pkey, dkey = jax.random.split(key)
    params = make_params(pkey, num_embeddings, embedding_size, max_length, num_layers)
    token_ids = jax.random.randint(dkey, (batch, max_length), 0, num_embeddings, dtype=jnp.int32)

    rnn, hidden = encoder_forward(token_ids, params)
    jax.block_until_ready((rnn, hidden))

    assert rnn.shape == (batch, max_length, embedding_size)
    assert hidden.shape == (num_layers, batch, embedding_size)

    # loose self-check against a pure-JAX reference (catches layout/padding bugs)
    with jax.default_matmul_precision("highest"):
        rnn_ref, hid_ref_v = encoder_reference(token_ids, params)
    assert bool(jnp.allclose(rnn, rnn_ref, atol=2e-2, rtol=2e-2))
    assert bool(jnp.allclose(hidden, hid_ref_v, atol=2e-2, rtol=2e-2))

    print("KERNEL_OK")
</pallas_src>

<mosaic_0001>
module attributes {stable_mosaic.version = 11 : i64} {
  func.func @gru_stack_kernel(%arg0: i32, %arg1: i32, %arg2: memref<8x8x128xf32, #tpu.memory_space<vmem>>, %arg3: memref<8x128xf32, #tpu.memory_space<vmem>>, %arg4: memref<1x128x384xf32, #tpu.memory_space<vmem>>, %arg5: memref<1x128x384xf32, #tpu.memory_space<vmem>>, %arg6: memref<1x1x384xf32, #tpu.memory_space<vmem>>, %arg7: memref<1x1x384xf32, #tpu.memory_space<vmem>>, %arg8: memref<8x8x128xf32, #tpu.memory_space<vmem>>, %arg9: memref<1x8x128xf32, #tpu.memory_space<vmem>>, %arg10: memref<8x8x384xf32, #tpu.memory_space<vmem>>, %arg11: memref<8x128xf32, #tpu.memory_space<vmem>>) attributes {dimension_semantics = [#tpu.dimension_semantics<parallel>, #tpu.dimension_semantics<arbitrary>], iteration_bounds = array<i64: 1, 2>, scalar_prefetch = 0 : i64, scratch_operands = 2 : i64, tpu.core_type = #tpu.core_type<tc>, window_params = [{transform_indices = @transform_0, window_bounds = array<i64: 8, 8, 128>}, {pipeline_mode = #tpu.pipeline_mode<synchronous>, transform_indices = @transform_1, window_bounds = array<i64: 8, 128>}, {transform_indices = @transform_2, window_bounds = array<i64: 1, 128, 384>}, {transform_indices = @transform_3, window_bounds = array<i64: 1, 128, 384>}, {transform_indices = @transform_4, window_bounds = array<i64: 1, 1, 384>}, {transform_indices = @transform_5, window_bounds = array<i64: 1, 1, 384>}, {transform_indices = @transform_6, window_bounds = array<i64: 8, 8, 128>}, {transform_indices = @transform_7, window_bounds = array<i64: 1, 8, 128>}]} {
    %c0_i32 = arith.constant 0 : i32
    %0 = arith.cmpi eq, %arg1, %c0_i32 : i32
    %1 = arith.extui %0 : i1 to i32
    %c0_i32_0 = arith.constant 0 : i32
    %2 = arith.cmpi ne, %1, %c0_i32_0 : i32
    scf.if %2 {
      %c0_123 = arith.constant 0 : index
      %c0_124 = arith.constant 0 : index
      %c0_125 = arith.constant 0 : index
      %323 = vector.load %arg2[%c0_123, %c0_124, %c0_125] : memref<8x8x128xf32, #tpu.memory_space<vmem>>, vector<8x8x128xf32>
      %c0_126 = arith.constant 0 : index
      %c0_127 = arith.constant 0 : index
      %324 = vector.load %arg3[%c0_126, %c0_127] : memref<8x128xf32, #tpu.memory_space<vmem>>, vector<8x128xf32>
      %325 = vector.shape_cast %324 : vector<8x128xf32> to vector<8x1x128xf32>
      %326 = vector.broadcast %325 : vector<8x1x128xf32> to vector<8x8x128xf32>
      %327 = arith.addf %323, %326 : vector<8x8x128xf32>
      %c0_128 = arith.constant 0 : index
      %c0_129 = arith.constant 0 : index
      %c0_130 = arith.constant 0 : index
      %328 = vector.load %arg8[%c0_128, %c0_129, %c0_130] : memref<8x8x128xf32, #tpu.memory_space<vmem>>, vector<8x8x128xf32>
      tpu.vector_store %arg8[%c0_128, %c0_129, %c0_130], %327 {strides = array<i32>} : memref<8x8x128xf32, #tpu.memory_space<vmem>>, vector<8x8x128xf32>,
    } else {
    }
    %cst = arith.constant 0.000000e+00 : f32
    %3 = vector.broadcast %cst : f32 to vector<8x128xf32>
    %c0 = arith.constant 0 : index
    %c0_1 = arith.constant 0 : index
    %4 = vector.load %arg11[%c0, %c0_1] : memref<8x128xf32, #tpu.memory_space<vmem>>, vector<8x128xf32>
    tpu.vector_store %arg11[%c0, %c0_1], %3 {strides = array<i32>} : memref<8x128xf32, #tpu.memory_space<vmem>>, vector<8x128xf32>,
    %c0_2 = arith.constant 0 : index
    %c0_3 = arith.constant 0 : index
    %c0_4 = arith.constant 0 : index
    %5 = vector.load %arg4[%c0_2, %c0_3, %c0_4] : memref<1x128x384xf32, #tpu.memory_space<vmem>>, vector<1x128x384xf32>
    %6 = vector.shape_cast %5 : vector<1x128x384xf32> to vector<128x384xf32>
    %c0_5 = arith.constant 0 : index
    %c0_6 = arith.constant 0 : index
    %c0_7 = arith.constant 0 : index
    %7 = vector.load %arg5[%c0_5, %c0_6, %c0_7] : memref<1x128x384xf32, #tpu.memory_space<vmem>>, vector<1x128x384xf32>
    %8 = vector.shape_cast %7 : vector<1x128x384xf32> to vector<128x384xf32>
    %c0_8 = arith.constant 0 : index
    %c0_9 = arith.constant 0 : index
    %c0_10 = arith.constant 0 : index
    %9 = vector.load %arg6[%c0_8, %c0_9, %c0_10] : memref<1x1x384xf32, #tpu.memory_space<vmem>>, vector<1x1x384xf32>
    %10 = vector.shape_cast %9 : vector<1x1x384xf32> to vector<1x384xf32>
    %11 = vector.shape_cast %10 : vector<1x384xf32> to vector<1x384xf32>
    %12 = vector.broadcast %11 : vector<1x384xf32> to vector<64x384xf32>
    %c0_11 = arith.constant 0 : index
    %c0_12 = arith.constant 0 : index
    %c0_13 = arith.constant 0 : index
    %13 = vector.load %arg7[%c0_11, %c0_12, %c0_13] : memref<1x1x384xf32, #tpu.memory_space<vmem>>, vector<1x1x384xf32>
    %14 = vector.shape_cast %13 : vector<1x1x384xf32> to vector<1x384xf32>
    %15 = vector.shape_cast %14 : vector<1x384xf32> to vector<1x384xf32>
    %16 = vector.broadcast %15 : vector<1x384xf32> to vector<8x384xf32>
    %c0_14 = arith.constant 0 : index
    %c0_15 = arith.constant 0 : index
    %c0_16 = arith.constant 0 : index
    %17 = vector.load %arg8[%c0_14, %c0_15, %c0_16] : memref<8x8x128xf32, #tpu.memory_space<vmem>>, vector<8x8x128xf32>
    %18 = vector.shape_cast %17 : vector<8x8x128xf32> to vector<64x128xf32>
    %cst_17 = arith.constant dense<0.000000e+00> : vector<64x384xf32>
    %19 = tpu.matmul %18, %6, %cst_17 {dimension_numbers = #tpu.dot_dimension_numbers<[1], [0], [0], [1], [0, 0, 1, 1], [], []>} : vector<64x128xf32>, vector<128x384xf32>, vector<64x384xf32> -> vector<64x384xf32>
    %20 = arith.addf %19, %12 : vector<64x384xf32>
    %21 = vector.shape_cast %20 : vector<64x384xf32> to vector<8x8x384xf32>
    %c0_18 = arith.constant 0 : index
    %c0_19 = arith.constant 0 : index
    %c0_20 = arith.constant 0 : index
    %22 = vector.load %arg10[%c0_18, %c0_19, %c0_20] : memref<8x8x384xf32, #tpu.memory_space<vmem>>, vector<8x8x384xf32>
    tpu.vector_store %arg10[%c0_18, %c0_19, %c0_20], %21 {strides = array<i32>} : memref<8x8x384xf32, #tpu.memory_space<vmem>>, vector<8x8x384xf32>,
    %c0_i32_21 = arith.constant 0 : i32
    %c0_22 = arith.constant 0 : index
    %c0_23 = arith.constant 0 : index
    %23 = vector.load %arg11[%c0_22, %c0_23] : memref<8x128xf32, #tpu.memory_space<vmem>>, vector<8x128xf32>
    %24 = arith.index_cast %c0_i32_21 : i32 to index
    %c0_24 = arith.constant 0 : index
    %c0_25 = arith.constant 0 : index
    %25 = vector.load %arg10[%24, %c0_24, %c0_25] : memref<8x8x384xf32, #tpu.memory_space<vmem>>, vector<1x8x384xf32>
    %26 = vector.shape_cast %25 : vector<1x8x384xf32> to vector<8x384xf32>
    %cst_26 = arith.constant dense<0.000000e+00> : vector<8x384xf32>
    %27 = tpu.matmul %23, %8, %cst_26 {dimension_numbers = #tpu.dot_dimension_numbers<[1], [0], [0], [1], [0, 0, 1, 1], [], []>} : vector<8x128xf32>, vector<128x384xf32>, vector<8x384xf32> -> vector<8x384xf32>
    %28 = arith.addf %27, %16 : vector<8x384xf32>
    %29 = vector.extract_strided_slice %26 {offsets = [0, 0], sizes = [8, 128], strides = [1, 1]} : vector<8x384xf32> to vector<8x128xf32>
    %30 = vector.extract_strided_slice %28 {offsets = [0, 0], sizes = [8, 128], strides = [1, 1]} : vector<8x384xf32> to vector<8x128xf32>
    %31 = arith.addf %29, %30 : vector<8x128xf32>
    %32 = arith.negf %31 : vector<8x128xf32>
    %33 = math.exp %32 : vector<8x128xf32>
    %cst_27 = arith.constant 1.000000e+00 : f32
    %34 = vector.broadcast %cst_27 : f32 to vector<8x128xf32>
    %35 = arith.addf %34, %33 : vector<8x128xf32>
    %36 = arith.divf %34, %35 : vector<8x128xf32>
    %37 = vector.extract_strided_slice %26 {offsets = [0, 128], sizes = [8, 128], strides = [1, 1]} : vector<8x384xf32> to vector<8x128xf32>
    %38 = vector.extract_strided_slice %28 {offsets = [0, 128], sizes = [8, 128], strides = [1, 1]} : vector<8x384xf32> to vector<8x128xf32>
    %39 = arith.addf %37, %38 : vector<8x128xf32>
    %40 = arith.negf %39 : vector<8x128xf32>
    %41 = math.exp %40 : vector<8x128xf32>
    %cst_28 = arith.constant 1.000000e+00 : f32
    %42 = vector.broadcast %cst_28 : f32 to vector<8x128xf32>
    %43 = arith.addf %42, %41 : vector<8x128xf32>
    %44 = arith.divf %42, %43 : vector<8x128xf32>
    %45 = vector.extract_strided_slice %26 {offsets = [0, 256], sizes = [8, 128], strides = [1, 1]} : vector<8x384xf32> to vector<8x128xf32>
    %46 = vector.extract_strided_slice %28 {offsets = [0, 256], sizes = [8, 128], strides = [1, 1]} : vector<8x384xf32> to vector<8x128xf32>
    %47 = arith.mulf %36, %46 : vector<8x128xf32>
    %48 = arith.addf %45, %47 : vector<8x128xf32>
    %49 = math.tanh %48 : vector<8x128xf32>
    %cst_29 = arith.constant 1.000000e+00 : f32
    %50 = vector.broadcast %cst_29 : f32 to vector<8x128xf32>
    %51 = arith.subf %50, %44 : vector<8x128xf32>
    %52 = arith.mulf %51, %49 : vector<8x128xf32>
    %53 = arith.mulf %44, %23 : vector<8x128xf32>
    %54 = arith.addf %52, %53 : vector<8x128xf32>
    %c0_30 = arith.constant 0 : index
    %c0_31 = arith.constant 0 : index
    %55 = vector.load %arg11[%c0_30, %c0_31] : memref<8x128xf32, #tpu.memory_space<vmem>>, vector<8x128xf32>
    tpu.vector_store %arg11[%c0_30, %c0_31], %54 {strides = array<i32>} : memref<8x128xf32, #tpu.memory_space<vmem>>, vector<8x128xf32>,
    %56 = arith.index_cast %c0_i32_21 : i32 to index
    %c0_32 = arith.constant 0 : index
    %c0_33 = arith.constant 0 : index
    %57 = vector.load %arg8[%56, %c0_32, %c0_33] : memref<8x8x128xf32, #tpu.memory_space<vmem>>, vector<1x8x128xf32>
    %58 = vector.shape_cast %57 : vector<1x8x128xf32> to vector<8x128xf32>
    %59 = vector.shape_cast %54 : vector<8x128xf32> to vector<1x8x128xf32>
    tpu.vector_store %arg8[%56, %c0_32, %c0_33], %59 {strides = array<i32>} : memref<8x8x128xf32, #tpu.memory_space<vmem>>, vector<1x8x128xf32>,
    %c1_i32 = arith.constant 1 : i32
    %c0_34 = arith.constant 0 : index
    %c0_35 = arith.constant 0 : index
    %60 = vector.load %arg11[%c0_34, %c0_35] : memref<8x128xf32, #tpu.memory_space<vmem>>, vector<8x128xf32>
    %61 = arith.index_cast %c1_i32 : i32 to index
    %c0_36 = arith.constant 0 : index
    %c0_37 = arith.constant 0 : index
    %62 = vector.load %arg10[%61, %c0_36, %c0_37] : memref<8x8x384xf32, #tpu.memory_space<vmem>>, vector<1x8x384xf32>
    %63 = vector.shape_cast %62 : vector<1x8x384xf32> to vector<8x384xf32>
    %cst_38 = arith.constant dense<0.000000e+00> : vector<8x384xf32>
    %64 = tpu.matmul %60, %8, %cst_38 {dimension_numbers = #tpu.dot_dimension_numbers<[1], [0], [0], [1], [0, 0, 1, 1], [], []>} : vector<8x128xf32>, vector<128x384xf32>, vector<8x384xf32> -> vector<8x384xf32>
    %65 = arith.addf %64, %16 : vector<8x384xf32>
    %66 = vector.extract_strided_slice %63 {offsets = [0, 0], sizes = [8, 128], strides = [1, 1]} : vector<8x384xf32> to vector<8x128xf32>
    %67 = vector.extract_strided_slice %65 {offsets = [0, 0], sizes = [8, 128], strides = [1, 1]} : vector<8x384xf32> to vector<8x128xf32>
    %68 = arith.addf %66, %67 : vector<8x128xf32>
    %69 = arith.negf %68 : vector<8x128xf32>
    %70 = math.exp %69 : vector<8x128xf32>
    %cst_39 = arith.constant 1.000000e+00 : f32
    %71 = vector.broadcast %cst_39 : f32 to vector<8x128xf32>
    %72 = arith.addf %71, %70 : vector<8x128xf32>
    %73 = arith.divf %71, %72 : vector<8x128xf32>
    %74 = vector.extract_strided_slice %63 {offsets = [0, 128], sizes = [8, 128], strides = [1, 1]} : vector<8x384xf32> to vector<8x128xf32>
    %75 = vector.extract_strided_slice %65 {offsets = [0, 128], sizes = [8, 128], strides = [1, 1]} : vector<8x384xf32> to vector<8x128xf32>
    %76 = arith.addf %74, %75 : vector<8x128xf32>
    %77 = arith.negf %76 : vector<8x128xf32>
    %78 = math.exp %77 : vector<8x128xf32>
    %cst_40 = arith.constant 1.000000e+00 : f32
    %79 = vector.broadcast %cst_40 : f32 to vector<8x128xf32>
    %80 = arith.addf %79, %78 : vector<8x128xf32>
    %81 = arith.divf %79, %80 : vector<8x128xf32>
    %82 = vector.extract_strided_slice %63 {offsets = [0, 256], sizes = [8, 128], strides = [1, 1]} : vector<8x384xf32> to vector<8x128xf32>
    %83 = vector.extract_strided_slice %65 {offsets = [0, 256], sizes = [8, 128], strides = [1, 1]} : vector<8x384xf32> to vector<8x128xf32>
    %84 = arith.mulf %73, %83 : vector<8x128xf32>
    %85 = arith.addf %82, %84 : vector<8x128xf32>
    %86 = math.tanh %85 : vector<8x128xf32>
    %cst_41 = arith.constant 1.000000e+00 : f32
    %87 = vector.broadcast %cst_41 : f32 to vector<8x128xf32>
    %88 = arith.subf %87, %81 : vector<8x128xf32>
    %89 = arith.mulf %88, %86 : vector<8x128xf32>
    %90 = arith.mulf %81, %60 : vector<8x128xf32>
    %91 = arith.addf %89, %90 : vector<8x128xf32>
    %c0_42 = arith.constant 0 : index
    %c0_43 = arith.constant 0 : index
    %92 = vector.load %arg11[%c0_42, %c0_43] : memref<8x128xf32, #tpu.memory_space<vmem>>, vector<8x128xf32>
    tpu.vector_store %arg11[%c0_42, %c0_43], %91 {strides = array<i32>} : memref<8x128xf32, #tpu.memory_space<vmem>>, vector<8x128xf32>,
    %93 = arith.index_cast %c1_i32 : i32 to index
    %c0_44 = arith.constant 0 : index
    %c0_45 = arith.constant 0 : index
    %94 = vector.load %arg8[%93, %c0_44, %c0_45] : memref<8x8x128xf32, #tpu.memory_space<vmem>>, vector<1x8x128xf32>
    %95 = vector.shape_cast %94 : vector<1x8x128xf32> to vector<8x128xf32>
    %96 = vector.shape_cast %91 : vector<8x128xf32> to vector<1x8x128xf32>
    tpu.vector_store %arg8[%93, %c0_44, %c0_45], %96 {strides = array<i32>} : memref<8x8x128xf32, #tpu.memory_space<vmem>>, vector<1x8x128xf32>,
    %c2_i32 = arith.constant 2 : i32
    %c0_46 = arith.constant 0 : index
    %c0_47 = arith.constant 0 : index
    %97 = vector.load %arg11[%c0_46, %c0_47] : memref<8x128xf32, #tpu.memory_space<vmem>>, vector<8x128xf32>
    %98 = arith.index_cast %c2_i32 : i32 to index
    %c0_48 = arith.constant 0 : index
    %c0_49 = arith.constant 0 : index
    %99 = vector.load %arg10[%98, %c0_48, %c0_49] : memref<8x8x384xf32, #tpu.memory_space<vmem>>, vector<1x8x384xf32>
    %100 = vector.shape_cast %99 : vector<1x8x384xf32> to vector<8x384xf32>
    %cst_50 = arith.constant dense<0.000000e+00> : vector<8x384xf32>
    %101 = tpu.matmul %97, %8, %cst_50 {dimension_numbers = #tpu.dot_dimension_numbers<[1], [0], [0], [1], [0, 0, 1, 1], [], []>} : vector<8x128xf32>, vector<128x384xf32>, vector<8x384xf32> -> vector<8x384xf32>
    %102 = arith.addf %101, %16 : vector<8x384xf32>
    %103 = vector.extract_strided_slice %100 {offsets = [0, 0], sizes = [8, 128], strides = [1, 1]} : vector<8x384xf32> to vector<8x128xf32>
    %104 = vector.extract_strided_slice %102 {offsets = [0, 0], sizes = [8, 128], strides = [1, 1]} : vector<8x384xf32> to vector<8x128xf32>
    %105 = arith.addf %103, %104 : vector<8x128xf32>
    %106 = arith.negf %105 : vector<8x128xf32>
    %107 = math.exp %106 : vector<8x128xf32>
    %cst_51 = arith.constant 1.000000e+00 : f32
    %108 = vector.broadcast %cst_51 : f32 to vector<8x128xf32>
    %109 = arith.addf %108, %107 : vector<8x128xf32>
    %110 = arith.divf %108, %109 : vector<8x128xf32>
    %111 = vector.extract_strided_slice %100 {offsets = [0, 128], sizes = [8, 128], strides = [1, 1]} : vector<8x384xf32> to vector<8x128xf32>
    %112 = vector.extract_strided_slice %102 {offsets = [0, 128], sizes = [8, 128], strides = [1, 1]} : vector<8x384xf32> to vector<8x128xf32>
    %113 = arith.addf %111, %112 : vector<8x128xf32>
    %114 = arith.negf %113 : vector<8x128xf32>
    %115 = math.exp %114 : vector<8x128xf32>
    %cst_52 = arith.constant 1.000000e+00 : f32
    %116 = vector.broadcast %cst_52 : f32 to vector<8x128xf32>
    %117 = arith.addf %116, %115 : vector<8x128xf32>
    %118 = arith.divf %116, %117 : vector<8x128xf32>
    %119 = vector.extract_strided_slice %100 {offsets = [0, 256], sizes = [8, 128], strides = [1, 1]} : vector<8x384xf32> to vector<8x128xf32>
    %120 = vector.extract_strided_slice %102 {offsets = [0, 256], sizes = [8, 128], strides = [1, 1]} : vector<8x384xf32> to vector<8x128xf32>
    %121 = arith.mulf %110, %120 : vector<8x128xf32>
    %122 = arith.addf %119, %121 : vector<8x128xf32>
    %123 = math.tanh %122 : vector<8x128xf32>
    %cst_53 = arith.constant 1.000000e+00 : f32
    %124 = vector.broadcast %cst_53 : f32 to vector<8x128xf32>
    %125 = arith.subf %124, %118 : vector<8x128xf32>
    %126 = arith.mulf %125, %123 : vector<8x128xf32>
    %127 = arith.mulf %118, %97 : vector<8x128xf32>
    %128 = arith.addf %126, %127 : vector<8x128xf32>
    %c0_54 = arith.constant 0 : index
    %c0_55 = arith.constant 0 : index
    %129 = vector.load %arg11[%c0_54, %c0_55] : memref<8x128xf32, #tpu.memory_space<vmem>>, vector<8x128xf32>
    tpu.vector_store %arg11[%c0_54, %c0_55], %128 {strides = array<i32>} : memref<8x128xf32, #tpu.memory_space<vmem>>, vector<8x128xf32>,
    %130 = arith.index_cast %c2_i32 : i32 to index
    %c0_56 = arith.constant 0 : index
    %c0_57 = arith.constant 0 : index
    %131 = vector.load %arg8[%130, %c0_56, %c0_57] : memref<8x8x128xf32, #tpu.memory_space<vmem>>, vector<1x8x128xf32>
    %132 = vector.shape_cast %131 : vector<1x8x128xf32> to vector<8x128xf32>
    %133 = vector.shape_cast %128 : vector<8x128xf32> to vector<1x8x128xf32>
    tpu.vector_store %arg8[%130, %c0_56, %c0_57], %133 {strides = array<i32>} : memref<8x8x128xf32, #tpu.memory_space<vmem>>, vector<1x8x128xf32>,
    %c3_i32 = arith.constant 3 : i32
    %c0_58 = arith.constant 0 : index
    %c0_59 = arith.constant 0 : index
    %134 = vector.load %arg11[%c0_58, %c0_59] : memref<8x128xf32, #tpu.memory_space<vmem>>, vector<8x128xf32>
    %135 = arith.index_cast %c3_i32 : i32 to index
    %c0_60 = arith.constant 0 : index
    %c0_61 = arith.constant 0 : index
    %136 = vector.load %arg10[%135, %c0_60, %c0_61] : memref<8x8x384xf32, #tpu.memory_space<vmem>>, vector<1x8x384xf32>
    %137 = vector.shape_cast %136 : vector<1x8x384xf32> to vector<8x384xf32>
    %cst_62 = arith.constant dense<0.000000e+00> : vector<8x384xf32>
    %138 = tpu.matmul %134, %8, %cst_62 {dimension_numbers = #tpu.dot_dimension_numbers<[1], [0], [0], [1], [0, 0, 1, 1], [], []>} : vector<8x128xf32>, vector<128x384xf32>, vector<8x384xf32> -> vector<8x384xf32>
    %139 = arith.addf %138, %16 : vector<8x384xf32>
    %140 = vector.extract_strided_slice %137 {offsets = [0, 0], sizes = [8, 128], strides = [1, 1]} : vector<8x384xf32> to vector<8x128xf32>
    %141 = vector.extract_strided_slice %139 {offsets = [0, 0], sizes = [8, 128], strides = [1, 1]} : vector<8x384xf32> to vector<8x128xf32>
    %142 = arith.addf %140, %141 : vector<8x128xf32>
    %143 = arith.negf %142 : vector<8x128xf32>
    %144 = math.exp %143 : vector<8x128xf32>
    %cst_63 = arith.constant 1.000000e+00 : f32
    %145 = vector.broadcast %cst_63 : f32 to vector<8x128xf32>
    %146 = arith.addf %145, %144 : vector<8x128xf32>
    %147 = arith.divf %145, %146 : vector<8x128xf32>
    %148 = vector.extract_strided_slice %137 {offsets = [0, 128], sizes = [8, 128], strides = [1, 1]} : vector<8x384xf32> to vector<8x128xf32>
    %149 = vector.extract_strided_slice %139 {offsets = [0, 128], sizes = [8, 128], strides = [1, 1]} : vector<8x384xf32> to vector<8x128xf32>
    %150 = arith.addf %148, %149 : vector<8x128xf32>
    %151 = arith.negf %150 : vector<8x128xf32>
    %152 = math.exp %151 : vector<8x128xf32>
    %cst_64 = arith.constant 1.000000e+00 : f32
    %153 = vector.broadcast %cst_64 : f32 to vector<8x128xf32>
    %154 = arith.addf %153, %152 : vector<8x128xf32>
    %155 = arith.divf %153, %154 : vector<8x128xf32>
    %156 = vector.extract_strided_slice %137 {offsets = [0, 256], sizes = [8, 128], strides = [1, 1]} : vector<8x384xf32> to vector<8x128xf32>
    %157 = vector.extract_strided_slice %139 {offsets = [0, 256], sizes = [8, 128], strides = [1, 1]} : vector<8x384xf32> to vector<8x128xf32>
    %158 = arith.mulf %147, %157 : vector<8x128xf32>
    %159 = arith.addf %156, %158 : vector<8x128xf32>
    %160 = math.tanh %159 : vector<8x128xf32>
    %cst_65 = arith.constant 1.000000e+00 : f32
    %161 = vector.broadcast %cst_65 : f32 to vector<8x128xf32>
    %162 = arith.subf %161, %155 : vector<8x128xf32>
    %163 = arith.mulf %162, %160 : vector<8x128xf32>
    %164 = arith.mulf %155, %134 : vector<8x128xf32>
    %165 = arith.addf %163, %164 : vector<8x128xf32>
    %c0_66 = arith.constant 0 : index
    %c0_67 = arith.constant 0 : index
    %166 = vector.load %arg11[%c0_66, %c0_67] : memref<8x128xf32, #tpu.memory_space<vmem>>, vector<8x128xf32>
    tpu.vector_store %arg11[%c0_66, %c0_67], %165 {strides = array<i32>} : memref<8x128xf32, #tpu.memory_space<vmem>>, vector<8x128xf32>,
    %167 = arith.index_cast %c3_i32 : i32 to index
    %c0_68 = arith.constant 0 : index
    %c0_69 = arith.constant 0 : index
    %168 = vector.load %arg8[%167, %c0_68, %c0_69] : memref<8x8x128xf32, #tpu.memory_space<vmem>>, vector<1x8x128xf32>
    %169 = vector.shape_cast %168 : vector<1x8x128xf32> to vector<8x128xf32>
    %170 = vector.shape_cast %165 : vector<8x128xf32> to vector<1x8x128xf32>
    tpu.vector_store %arg8[%167, %c0_68, %c0_69], %170 {strides = array<i32>} : memref<8x8x128xf32, #tpu.memory_space<vmem>>, vector<1x8x128xf32>,
    %c4_i32 = arith.constant 4 : i32
    %c0_70 = arith.constant 0 : index
    %c0_71 = arith.constant 0 : index
    %171 = vector.load %arg11[%c0_70, %c0_71] : memref<8x128xf32, #tpu.memory_space<vmem>>, vector<8x128xf32>
    %172 = arith.index_cast %c4_i32 : i32 to index
    %c0_72 = arith.constant 0 : index
    %c0_73 = arith.constant 0 : index
    %173 = vector.load %arg10[%172, %c0_72, %c0_73] : memref<8x8x384xf32, #tpu.memory_space<vmem>>, vector<1x8x384xf32>
    %174 = vector.shape_cast %173 : vector<1x8x384xf32> to vector<8x384xf32>
    %cst_74 = arith.constant dense<0.000000e+00> : vector<8x384xf32>
    %175 = tpu.matmul %171, %8, %cst_74 {dimension_numbers = #tpu.dot_dimension_numbers<[1], [0], [0], [1], [0, 0, 1, 1], [], []>} : vector<8x128xf32>, vector<128x384xf32>, vector<8x384xf32> -> vector<8x384xf32>
    %176 = arith.addf %175, %16 : vector<8x384xf32>
    %177 = vector.extract_strided_slice %174 {offsets = [0, 0], sizes = [8, 128], strides = [1, 1]} : vector<8x384xf32> to vector<8x128xf32>
    %178 = vector.extract_strided_slice %176 {offsets = [0, 0], sizes = [8, 128], strides = [1, 1]} : vector<8x384xf32> to vector<8x128xf32>
    %179 = arith.addf %177, %178 : vector<8x128xf32>
    %180 = arith.negf %179 : vector<8x128xf32>
    %181 = math.exp %180 : vector<8x128xf32>
    %cst_75 = arith.constant 1.000000e+00 : f32
    %182 = vector.broadcast %cst_75 : f32 to vector<8x128xf32>
    %183 = arith.addf %182, %181 : vector<8x128xf32>
    %184 = arith.divf %182, %183 : vector<8x128xf32>
    %185 = vector.extract_strided_slice %174 {offsets = [0, 128], sizes = [8, 128], strides = [1, 1]} : vector<8x384xf32> to vector<8x128xf32>
    %186 = vector.extract_strided_slice %176 {offsets = [0, 128], sizes = [8, 128], strides = [1, 1]} : vector<8x384xf32> to vector<8x128xf32>
    %187 = arith.addf %185, %186 : vector<8x128xf32>
    %188 = arith.negf %187 : vector<8x128xf32>
    %189 = math.exp %188 : vector<8x128xf32>
    %cst_76 = arith.constant 1.000000e+00 : f32
    %190 = vector.broadcast %cst_76 : f32 to vector<8x128xf32>
    %191 = arith.addf %190, %189 : vector<8x128xf32>
    %192 = arith.divf %190, %191 : vector<8x128xf32>
    %193 = vector.extract_strided_slice %174 {offsets = [0, 256], sizes = [8, 128], strides = [1, 1]} : vector<8x384xf32> to vector<8x128xf32>
    %194 = vector.extract_strided_slice %176 {offsets = [0, 256], sizes = [8, 128], strides = [1, 1]} : vector<8x384xf32> to vector<8x128xf32>
    %195 = arith.mulf %184, %194 : vector<8x128xf32>
    %196 = arith.addf %193, %195 : vector<8x128xf32>
    %197 = math.tanh %196 : vector<8x128xf32>
    %cst_77 = arith.constant 1.000000e+00 : f32
    %198 = vector.broadcast %cst_77 : f32 to vector<8x128xf32>
    %199 = arith.subf %198, %192 : vector<8x128xf32>
    %200 = arith.mulf %199, %197 : vector<8x128xf32>
    %201 = arith.mulf %192, %171 : vector<8x128xf32>
    %202 = arith.addf %200, %201 : vector<8x128xf32>
    %c0_78 = arith.constant 0 : index
    %c0_79 = arith.constant 0 : index
    %203 = vector.load %arg11[%c0_78, %c0_79] : memref<8x128xf32, #tpu.memory_space<vmem>>, vector<8x128xf32>
    tpu.vector_store %arg11[%c0_78, %c0_79], %202 {strides = array<i32>} : memref<8x128xf32, #tpu.memory_space<vmem>>, vector<8x128xf32>,
    %204 = arith.index_cast %c4_i32 : i32 to index
    %c0_80 = arith.constant 0 : index
    %c0_81 = arith.constant 0 : index
    %205 = vector.load %arg8[%204, %c0_80, %c0_81] : memref<8x8x128xf32, #tpu.memory_space<vmem>>, vector<1x8x128xf32>
    %206 = vector.shape_cast %205 : vector<1x8x128xf32> to vector<8x128xf32>
    %207 = vector.shape_cast %202 : vector<8x128xf32> to vector<1x8x128xf32>
    tpu.vector_store %arg8[%204, %c0_80, %c0_81], %207 {strides = array<i32>} : memref<8x8x128xf32, #tpu.memory_space<vmem>>, vector<1x8x128xf32>,
    %c5_i32 = arith.constant 5 : i32
    %c0_82 = arith.constant 0 : index
    %c0_83 = arith.constant 0 : index
    %208 = vector.load %arg11[%c0_82, %c0_83] : memref<8x128xf32, #tpu.memory_space<vmem>>, vector<8x128xf32>
    %209 = arith.index_cast %c5_i32 : i32 to index
    %c0_84 = arith.constant 0 : index
    %c0_85 = arith.constant 0 : index
    %210 = vector.load %arg10[%209, %c0_84, %c0_85] : memref<8x8x384xf32, #tpu.memory_space<vmem>>, vector<1x8x384xf32>
    %211 = vector.shape_cast %210 : vector<1x8x384xf32> to vector<8x384xf32>
    %cst_86 = arith.constant dense<0.000000e+00> : vector<8x384xf32>
    %212 = tpu.matmul %208, %8, %cst_86 {dimension_numbers = #tpu.dot_dimension_numbers<[1], [0], [0], [1], [0, 0, 1, 1], [], []>} : vector<8x128xf32>, vector<128x384xf32>, vector<8x384xf32> -> vector<8x384xf32>
    %213 = arith.addf %212, %16 : vector<8x384xf32>
    %214 = vector.extract_strided_slice %211 {offsets = [0, 0], sizes = [8, 128], strides = [1, 1]} : vector<8x384xf32> to vector<8x128xf32>
    %215 = vector.extract_strided_slice %213 {offsets = [0, 0], sizes = [8, 128], strides = [1, 1]} : vector<8x384xf32> to vector<8x128xf32>
    %216 = arith.addf %214, %215 : vector<8x128xf32>
    %217 = arith.negf %216 : vector<8x128xf32>
    %218 = math.exp %217 : vector<8x128xf32>
    %cst_87 = arith.constant 1.000000e+00 : f32
    %219 = vector.broadcast %cst_87 : f32 to vector<8x128xf32>
    %220 = arith.addf %219, %218 : vector<8x128xf32>
    %221 = arith.divf %219, %220 : vector<8x128xf32>
    %222 = vector.extract_strided_slice %211 {offsets = [0, 128], sizes = [8, 128], strides = [1, 1]} : vector<8x384xf32> to vector<8x128xf32>
    %223 = vector.extract_strided_slice %213 {offsets = [0, 128], sizes = [8, 128], strides = [1, 1]} : vector<8x384xf32> to vector<8x128xf32>
    %224 = arith.addf %222, %223 : vector<8x128xf32>
    %225 = arith.negf %224 : vector<8x128xf32>
    %226 = math.exp %225 : vector<8x128xf32>
    %cst_88 = arith.constant 1.000000e+00 : f32
    %227 = vector.broadcast %cst_88 : f32 to vector<8x128xf32>
    %228 = arith.addf %227, %226 : vector<8x128xf32>
    %229 = arith.divf %227, %228 : vector<8x128xf32>
    %230 = vector.extract_strided_slice %211 {offsets = [0, 256], sizes = [8, 128], strides = [1, 1]} : vector<8x384xf32> to vector<8x128xf32>
    %231 = vector.extract_strided_slice %213 {offsets = [0, 256], sizes = [8, 128], strides = [1, 1]} : vector<8x384xf32> to vector<8x128xf32>
    %232 = arith.mulf %221, %231 : vector<8x128xf32>
    %233 = arith.addf %230, %232 : vector<8x128xf32>
    %234 = math.tanh %233 : vector<8x128xf32>
    %cst_89 = arith.constant 1.000000e+00 : f32
    %235 = vector.broadcast %cst_89 : f32 to vector<8x128xf32>
    %236 = arith.subf %235, %229 : vector<8x128xf32>
    %237 = arith.mulf %236, %234 : vector<8x128xf32>
    %238 = arith.mulf %229, %208 : vector<8x128xf32>
    %239 = arith.addf %237, %238 : vector<8x128xf32>
    %c0_90 = arith.constant 0 : index
    %c0_91 = arith.constant 0 : index
    %240 = vector.load %arg11[%c0_90, %c0_91] : memref<8x128xf32, #tpu.memory_space<vmem>>, vector<8x128xf32>
    tpu.vector_store %arg11[%c0_90, %c0_91], %239 {strides = array<i32>} : memref<8x128xf32, #tpu.memory_space<vmem>>, vector<8x128xf32>,
    %241 = arith.index_cast %c5_i32 : i32 to index
    %c0_92 = arith.constant 0 : index
    %c0_93 = arith.constant 0 : index
    %242 = vector.load %arg8[%241, %c0_92, %c0_93] : memref<8x8x128xf32, #tpu.memory_space<vmem>>, vector<1x8x128xf32>
    %243 = vector.shape_cast %242 : vector<1x8x128xf32> to vector<8x128xf32>
    %244 = vector.shape_cast %239 : vector<8x128xf32> to vector<1x8x128xf32>
    tpu.vector_store %arg8[%241, %c0_92, %c0_93], %244 {strides = array<i32>} : memref<8x8x128xf32, #tpu.memory_space<vmem>>, vector<1x8x128xf32>,
    %c6_i32 = arith.constant 6 : i32
    %c0_94 = arith.constant 0 : index
    %c0_95 = arith.constant 0 : index
    %245 = vector.load %arg11[%c0_94, %c0_95] : memref<8x128xf32, #tpu.memory_space<vmem>>, vector<8x128xf32>
    %246 = arith.index_cast %c6_i32 : i32 to index
    %c0_96 = arith.constant 0 : index
    %c0_97 = arith.constant 0 : index
    %247 = vector.load %arg10[%246, %c0_96, %c0_97] : memref<8x8x384xf32, #tpu.memory_space<vmem>>, vector<1x8x384xf32>
    %248 = vector.shape_cast %247 : vector<1x8x384xf32> to vector<8x384xf32>
    %cst_98 = arith.constant dense<0.000000e+00> : vector<8x384xf32>
    %249 = tpu.matmul %245, %8, %cst_98 {dimension_numbers = #tpu.dot_dimension_numbers<[1], [0], [0], [1], [0, 0, 1, 1], [], []>} : vector<8x128xf32>, vector<128x384xf32>, vector<8x384xf32> -> vector<8x384xf32>
    %250 = arith.addf %249, %16 : vector<8x384xf32>
    %251 = vector.extract_strided_slice %248 {offsets = [0, 0], sizes = [8, 128], strides = [1, 1]} : vector<8x384xf32> to vector<8x128xf32>
    %252 = vector.extract_strided_slice %250 {offsets = [0, 0], sizes = [8, 128], strides = [1, 1]} : vector<8x384xf32> to vector<8x128xf32>
    %253 = arith.addf %251, %252 : vector<8x128xf32>
    %254 = arith.negf %253 : vector<8x128xf32>
    %255 = math.exp %254 : vector<8x128xf32>
    %cst_99 = arith.constant 1.000000e+00 : f32
    %256 = vector.broadcast %cst_99 : f32 to vector<8x128xf32>
    %257 = arith.addf %256, %255 : vector<8x128xf32>
    %258 = arith.divf %256, %257 : vector<8x128xf32>
    %259 = vector.extract_strided_slice %248 {offsets = [0, 128], sizes = [8, 128], strides = [1, 1]} : vector<8x384xf32> to vector<8x128xf32>
    %260 = vector.extract_strided_slice %250 {offsets = [0, 128], sizes = [8, 128], strides = [1, 1]} : vector<8x384xf32> to vector<8x128xf32>
    %261 = arith.addf %259, %260 : vector<8x128xf32>
    %262 = arith.negf %261 : vector<8x128xf32>
    %263 = math.exp %262 : vector<8x128xf32>
    %cst_100 = arith.constant 1.000000e+00 : f32
    %264 = vector.broadcast %cst_100 : f32 to vector<8x128xf32>
    %265 = arith.addf %264, %263 : vector<8x128xf32>
    %266 = arith.divf %264, %265 : vector<8x128xf32>
    %267 = vector.extract_strided_slice %248 {offsets = [0, 256], sizes = [8, 128], strides = [1, 1]} : vector<8x384xf32> to vector<8x128xf32>
    %268 = vector.extract_strided_slice %250 {offsets = [0, 256], sizes = [8, 128], strides = [1, 1]} : vector<8x384xf32> to vector<8x128xf32>
    %269 = arith.mulf %258, %268 : vector<8x128xf32>
    %270 = arith.addf %267, %269 : vector<8x128xf32>
    %271 = math.tanh %270 : vector<8x128xf32>
    %cst_101 = arith.constant 1.000000e+00 : f32
    %272 = vector.broadcast %cst_101 : f32 to vector<8x128xf32>
    %273 = arith.subf %272, %266 : vector<8x128xf32>
    %274 = arith.mulf %273, %271 : vector<8x128xf32>
    %275 = arith.mulf %266, %245 : vector<8x128xf32>
    %276 = arith.addf %274, %275 : vector<8x128xf32>
    %c0_102 = arith.constant 0 : index
    %c0_103 = arith.constant 0 : index
    %277 = vector.load %arg11[%c0_102, %c0_103] : memref<8x128xf32, #tpu.memory_space<vmem>>, vector<8x128xf32>
    tpu.vector_store %arg11[%c0_102, %c0_103], %276 {strides = array<i32>} : memref<8x128xf32, #tpu.memory_space<vmem>>, vector<8x128xf32>,
    %278 = arith.index_cast %c6_i32 : i32 to index
    %c0_104 = arith.constant 0 : index
    %c0_105 = arith.constant 0 : index
    %279 = vector.load %arg8[%278, %c0_104, %c0_105] : memref<8x8x128xf32, #tpu.memory_space<vmem>>, vector<1x8x128xf32>
    %280 = vector.shape_cast %279 : vector<1x8x128xf32> to vector<8x128xf32>
    %281 = vector.shape_cast %276 : vector<8x128xf32> to vector<1x8x128xf32>
    tpu.vector_store %arg8[%278, %c0_104, %c0_105], %281 {strides = array<i32>} : memref<8x8x128xf32, #tpu.memory_space<vmem>>, vector<1x8x128xf32>,
    %c7_i32 = arith.constant 7 : i32
    %c0_106 = arith.constant 0 : index
    %c0_107 = arith.constant 0 : index
    %282 = vector.load %arg11[%c0_106, %c0_107] : memref<8x128xf32, #tpu.memory_space<vmem>>, vector<8x128xf32>
    %283 = arith.index_cast %c7_i32 : i32 to index
    %c0_108 = arith.constant 0 : index
    %c0_109 = arith.constant 0 : index
    %284 = vector.load %arg10[%283, %c0_108, %c0_109] : memref<8x8x384xf32, #tpu.memory_space<vmem>>, vector<1x8x384xf32>
    %285 = vector.shape_cast %284 : vector<1x8x384xf32> to vector<8x384xf32>
    %cst_110 = arith.constant dense<0.000000e+00> : vector<8x384xf32>
    %286 = tpu.matmul %282, %8, %cst_110 {dimension_numbers = #tpu.dot_dimension_numbers<[1], [0], [0], [1], [0, 0, 1, 1], [], []>} : vector<8x128xf32>, vector<128x384xf32>, vector<8x384xf32> -> vector<8x384xf32>
    %287 = arith.addf %286, %16 : vector<8x384xf32>
    %288 = vector.extract_strided_slice %285 {offsets = [0, 0], sizes = [8, 128], strides = [1, 1]} : vector<8x384xf32> to vector<8x128xf32>
    %289 = vector.extract_strided_slice %287 {offsets = [0, 0], sizes = [8, 128], strides = [1, 1]} : vector<8x384xf32> to vector<8x128xf32>
    %290 = arith.addf %288, %289 : vector<8x128xf32>
    %291 = arith.negf %290 : vector<8x128xf32>
    %292 = math.exp %291 : vector<8x128xf32>
    %cst_111 = arith.constant 1.000000e+00 : f32
    %293 = vector.broadcast %cst_111 : f32 to vector<8x128xf32>
    %294 = arith.addf %293, %292 : vector<8x128xf32>
    %295 = arith.divf %293, %294 : vector<8x128xf32>
    %296 = vector.extract_strided_slice %285 {offsets = [0, 128], sizes = [8, 128], strides = [1, 1]} : vector<8x384xf32> to vector<8x128xf32>
    %297 = vector.extract_strided_slice %287 {offsets = [0, 128], sizes = [8, 128], strides = [1, 1]} : vector<8x384xf32> to vector<8x128xf32>
    %298 = arith.addf %296, %297 : vector<8x128xf32>
    %299 = arith.negf %298 : vector<8x128xf32>
    %300 = math.exp %299 : vector<8x128xf32>
    %cst_112 = arith.constant 1.000000e+00 : f32
    %301 = vector.broadcast %cst_112 : f32 to vector<8x128xf32>
    %302 = arith.addf %301, %300 : vector<8x128xf32>
    %303 = arith.divf %301, %302 : vector<8x128xf32>
    %304 = vector.extract_strided_slice %285 {offsets = [0, 256], sizes = [8, 128], strides = [1, 1]} : vector<8x384xf32> to vector<8x128xf32>
    %305 = vector.extract_strided_slice %287 {offsets = [0, 256], sizes = [8, 128], strides = [1, 1]} : vector<8x384xf32> to vector<8x128xf32>
    %306 = arith.mulf %295, %305 : vector<8x128xf32>
    %307 = arith.addf %304, %306 : vector<8x128xf32>
    %308 = math.tanh %307 : vector<8x128xf32>
    %cst_113 = arith.constant 1.000000e+00 : f32
    %309 = vector.broadcast %cst_113 : f32 to vector<8x128xf32>
    %310 = arith.subf %309, %303 : vector<8x128xf32>
    %311 = arith.mulf %310, %308 : vector<8x128xf32>
    %312 = arith.mulf %303, %282 : vector<8x128xf32>
    %313 = arith.addf %311, %312 : vector<8x128xf32>
    %c0_114 = arith.constant 0 : index
    %c0_115 = arith.constant 0 : index
    %314 = vector.load %arg11[%c0_114, %c0_115] : memref<8x128xf32, #tpu.memory_space<vmem>>, vector<8x128xf32>
    tpu.vector_store %arg11[%c0_114, %c0_115], %313 {strides = array<i32>} : memref<8x128xf32, #tpu.memory_space<vmem>>, vector<8x128xf32>,
    %315 = arith.index_cast %c7_i32 : i32 to index
    %c0_116 = arith.constant 0 : index
    %c0_117 = arith.constant 0 : index
    %316 = vector.load %arg8[%315, %c0_116, %c0_117] : memref<8x8x128xf32, #tpu.memory_space<vmem>>, vector<1x8x128xf32>
    %317 = vector.shape_cast %316 : vector<1x8x128xf32> to vector<8x128xf32>
    %318 = vector.shape_cast %313 : vector<8x128xf32> to vector<1x8x128xf32>
    tpu.vector_store %arg8[%315, %c0_116, %c0_117], %318 {strides = array<i32>} : memref<8x8x128xf32, #tpu.memory_space<vmem>>, vector<1x8x128xf32>,
    %c8_i32 = arith.constant 8 : i32
    %c0_118 = arith.constant 0 : index
    %c0_119 = arith.constant 0 : index
    %319 = vector.load %arg11[%c0_118, %c0_119] : memref<8x128xf32, #tpu.memory_space<vmem>>, vector<8x128xf32>
    %c0_120 = arith.constant 0 : index
    %c0_121 = arith.constant 0 : index
    %c0_122 = arith.constant 0 : index
    %320 = vector.load %arg9[%c0_120, %c0_121, %c0_122] : memref<1x8x128xf32, #tpu.memory_space<vmem>>, vector<1x8x128xf32>
    %321 = vector.shape_cast %320 : vector<1x8x128xf32> to vector<8x128xf32>
    %322 = vector.shape_cast %319 : vector<8x128xf32> to vector<1x8x128xf32>
    tpu.vector_store %arg9[%c0_120, %c0_121, %c0_122], %322 {strides = array<i32>} : memref<1x8x128xf32, #tpu.memory_space<vmem>>, vector<1x8x128xf32>,
    return
  }
  func.func @transform_0(%arg0: i32, %arg1: i32) -> (i32, i32, i32) {
    %c0_i32 = arith.constant 0 : i32
    %c0_i32_0 = arith.constant 0 : i32
    %c0_i32_1 = arith.constant 0 : i32
    return %c0_i32, %arg0, %c0_i32_0 : i32, i32, i32
  }
  func.func @transform_1(%arg0: i32, %arg1: i32) -> (i32, i32) {
    %c0_i32 = arith.constant 0 : i32
    %c0_i32_0 = arith.constant 0 : i32
    %c0_i32_1 = arith.constant 0 : i32
    return %c0_i32, %c0_i32_0 : i32, i32
  }
  func.func @transform_2(%arg0: i32, %arg1: i32) -> (i32, i32, i32) {
    %c0_i32 = arith.constant 0 : i32
    %c0_i32_0 = arith.constant 0 : i32
    %c0_i32_1 = arith.constant 0 : i32
    return %arg1, %c0_i32, %c0_i32_0 : i32, i32, i32
  }
  func.func @transform_3(%arg0: i32, %arg1: i32) -> (i32, i32, i32) {
    %c0_i32 = arith.constant 0 : i32
    %c0_i32_0 = arith.constant 0 : i32
    %c0_i32_1 = arith.constant 0 : i32
    return %arg1, %c0_i32, %c0_i32_0 : i32, i32, i32
  }
  func.func @transform_4(%arg0: i32, %arg1: i32) -> (i32, i32, i32) {
    %c0_i32 = arith.constant 0 : i32
    %c0_i32_0 = arith.constant 0 : i32
    %c0_i32_1 = arith.constant 0 : i32
    return %arg1, %c0_i32, %c0_i32_0 : i32, i32, i32
  }
  func.func @transform_5(%arg0: i32, %arg1: i32) -> (i32, i32, i32) {
    %c0_i32 = arith.constant 0 : i32
    %c0_i32_0 = arith.constant 0 : i32
    %c0_i32_1 = arith.constant 0 : i32
    return %arg1, %c0_i32, %c0_i32_0 : i32, i32, i32
  }
  func.func @transform_6(%arg0: i32, %arg1: i32) -> (i32, i32, i32) {
    %c0_i32 = arith.constant 0 : i32
    %c0_i32_0 = arith.constant 0 : i32
    %c0_i32_1 = arith.constant 0 : i32
    return %c0_i32, %arg0, %c0_i32_0 : i32, i32, i32
  }
  func.func @transform_7(%arg0: i32, %arg1: i32) -> (i32, i32, i32) {
    %c0_i32 = arith.constant 0 : i32
    %c0_i32_0 = arith.constant 0 : i32
    return %arg1, %arg0, %c0_i32 : i32, i32, i32
  }
}

</mosaic_0001>

<bundles_post_ra>
// kernel: tpu_custom_call.1
= control target key start
LH: loop header
LB: loop body
LE: loop exit
PB: predicated region body
PF: predicated region fallthrough
CT: control target
= control target key end

     0   :  { %s5089_s0 = inlined_call_operand.hbm [shape: f32[8,8,128], index: 0, kind: input, shape index: {}]   ;;  %s5090_s1 = inlined_call_operand.hbm [shape: f32[8,128], index: 1, kind: input, shape index: {}]   ;;  %s5091_s2 = inlined_call_operand.hbm [shape: f32[2,128,384], index: 2, kind: input, shape index: {}]   ;;  %s5092_s3 = inlined_call_operand.hbm [shape: f32[2,128,384], index: 3, kind: input, shape index: {}]   ;;  %s5093_s4 = inlined_call_operand.hbm [shape: f32[2,1,384], index: 4, kind: input, shape index: {}]   ;;  %s5094_s5 = inlined_call_operand.hbm [shape: f32[2,1,384], index: 5, kind: input, shape index: {}]   ;;  %s5095_s6 = inlined_call_operand.hbm [shape: f32[8,8,128], index: 6, kind: output, shape index: {0}]   ;;  %s5096_s7 = inlined_call_operand.hbm [shape: f32[2,8,128], index: 7, kind: output, shape index: {1}]  }
   0x1   :  { %5118 = sst [smem:[#allocation27_spill]] %s5089_s0 }
   0x2   :  { %5119 = sst [smem:[#allocation28_spill]] %s5091_s2 }
   0x3   :  { %5120 = sst [smem:[#allocation29_spill]] %s5095_s6 }
   0x4   :  { %13 = vsyncpa [#allocation5], 0 }
   0x5   :  { %14 = vsyncpa [#allocation8], 0 }
   0x6   :  { %15 = vsyncpa [#allocation6], 0 }
   0x7   :  { %16 = vsyncpa [#allocation15], 0 }
   0x8   :  { %18 = vsyncpa [#allocation15 + $0x1], 0  ;;  %s4162_s24 = smov 0   ;;  %s4164_s25 = smov 0  }
   0x9   :  { %s4166_s26 = smov 0   ;;  %s4168_s27 = smov 0  }
   0xa   :  { %s4170_s28 = smov 0   ;;  %s4172_s29 = smov 0  }
   0xb LB: > { %5121 = sst [smem:[#allocation21_spill]] %s4082_s24  ;;  %s4193_s30 = sadd.s32 4294967295, %s4102_s29   ;;  %s4102_s29 = sphi %s4172_s29, %s24_s29   ;;  %s4098_s28 = sphi %s4170_s28, %s5171_s28   ;;  %s4094_s27 = sphi %s4168_s27, %s5170_s27   ;;  %s4090_s26 = sphi %s4166_s26, %s5169_s26   ;;  %s4086_s25 = sphi %s4164_s25, %s5168_s25   ;;  %s4082_s24 = sphi %s4162_s24, %s5167_s24  }
   0xc   : > { %5122 = sst [smem:[#allocation22_spill]] %s4102_s29  ;;  %s2520_s8 = sadd.s32 4294967294, %s4102_s29  }
   0xd   : > { %p97_p0 = scmp.ne.s32.totalorder %s4090_s26, %s4086_s25  ;;  %p98_p1 = scmp.eq.s32.totalorder %s4102_s29, 0 }
   0xe   : > { %p103_p2 = scmp.ne.s32.totalorder %s4086_s25, %s4082_s24  ;;  %p5098_p3 = scmp.eq.s32.totalorder %s4193_s30, 0 }
   0xf   : > { %p5097_p4 = scmp.eq.s32.totalorder %s4193_s30, 1  ;;  %p4204_p5 = por %p98_p1, %p97_p0 }
  0x10   : > { %p239_p6 = scmp.eq.s32.totalorder %s2520_s8, 1  ;;  %p4210_p7 = por %p5098_p3, %p103_p2 }
  0x11   : > { %p4216_p8 = por %p5097_p4, %p97_p0  ;;  %p2521_p10 = scmp.ge.s32.totalorder %s4102_s29, 1 }
  0x12   : > { %s5124_s11 = scalar_select %p4210_p7, 1, 0 }
  0x13   : > { %s5125_s12 = scalar_select %p4216_p8, 1, 0 }
  0x14   : > { %p4220_p9 = por %p239_p6, %p103_p2  ;;  %p246_p11 = scmp.lt.s32.totalorder %s4102_s29, 3 }
  0x15   : > { %5126 = sst [smem:[#allocation23_spill]] %s5125_s12  ;;  %s4104_s15 = smov [#allocation4]  }
  0x16   : > { %s5127_s13 = scalar_select %p4220_p9, 1, 0 }
  0x17   : > { %p4226_p12 = pnand %p2521_p10, %p246_p11  ;;  %s260_s16 = sshll.u32 %s4104_s15, 4  ;;  %s4230_s16 = int_to_ptr.vmem [resolvable:$true] %s260_s16 }
  0x18   : > { %5128 = sst [smem:[#allocation24_spill]] %s5127_s13  ;;  %p3658_p1 = scmp.lt.s32.totalorder %s4102_s29, 2 }
  0x19   : > { %s5129_s14 = scalar_select %p4226_p12, 1, 0 }
  0x1a   : > { %p3632_p13 = pneg %p4226_p12  ;;  %p4244_p6 = pnand %p3658_p1, %p4204_p5 }
  0x1b   : > { %s33_s19 = sadd.s32 1, %s4098_s28  ;;  %s5133_s0 = sld [smem:[#allocation27_spill]] }
  0x1c   : > { %p4238_p2 = pnand %p3632_p13, %p5098_p3  ;;  %p4249_p10 = scmp.ge.s32.totalorder %s33_s19, 2 }
  0x1d   : > { %s5131_s18 = scalar_select %p4244_p6, 1, 0 }
  0x1e   : > { %s5130_s17 = scalar_select %p4238_p2, 1, 0 }
  0x1f   : > { %p5109_p13 = pneg %p4238_p2 }
  0x21   : > { %s3806_s23 = scalar_lea.hbm %s5133_s0, 1024 }
  0x22   : > { %p3807_p11 = scmp.ne.s32.totalorder %s5133_s0, %s3806_s23  ;;  %p3813_p0 = scmp.lt.u32.totalorder %s3806_s23, %s5133_s0 }
  0x24   : > { %p3809_p5 = pnand %p5109_p13, %p3807_p11 }
  0x26   : > { %p3810_p1 = pneg %p3809_p5 }
  0x28   : > { %p3815_p4 = pnand %p3813_p0, %p3810_p1 }
  0x2a   : > { %3818 = shalt.err (!%p3815_p4)
}
  0x2b   : > { %s3819_s21 = scalar_lea.vmem %s4230_s16, 1024  ;;  %p3827_p7 = scmp.lt.s32.totalorder %s4230_s16, %s4230_s16 }
  0x2c   : > { %p3820_p3 = scmp.ne.s32.totalorder %s4230_s16, %s3819_s21  ;;  %p3828_p11 = scmp.lt.s32.totalorder %s3819_s21, %s3819_s21 }
  0x2e   : > { %p3822_p9 = pnand %p3820_p3, %p5109_p13  ;;  %p3829_p5 = por %p3828_p11, %p3827_p7 }
  0x30   : > { %p3823_p8 = pneg %p3822_p9 }
  0x32   : > { %p3830_p12 = pnand %p3829_p5, %p3823_p8 }
  0x34   : > { %3833 = shalt.err (!%p3830_p12)
}
  0x35   : > { %s4105_s9 = smov 128   ;;  %s4106_s22 = smov 8  }
  0x36   : > { %3635 = dma.hbm_to_vmem [thread:$0]  (!%p4238_p2), %s5133_s0, 1024, %s4230_s16, [#allocation5], %s4105_s9, %s4105_s9, %s4106_s22  }
  0x37   : > { %s285_s15 = sand.u32 1, %s4102_s29   ;;  %s5173_s19 = smov (%p4249_p10, %s33_s19), 0 }
  0x38   : > { %5134 = sst [smem:[#allocation25_spill]] %s5173_s19  ;;  %s5107_s10 = sand.u32 1, %s4090_s26  }
  0x39   : > { %s87_s21 = ssub.s32 %s4098_s28, %s5173_s19  ;;  %s4290_s13 = smul.u32 384, %s5107_s10 }
  0x3a   : > { %p88_p3 = scmp.eq.s32.totalorder %s87_s21, 0  ;;  %s5108_s24 = smul.u32 6144, %s4098_s28 }
  0x3b   : > { %s5135_s12 = sadd.s32 1, %s4090_s26  ;;  %s5137_s2 = sld [smem:[#allocation28_spill]] }
  0x3c   : > { %s4296_s6 = scalar_select %p88_p3, %s4090_s26, %s5135_s12  }
  0x3d   : > { %s289_s20 = scalar_lea.vmem [#allocation9], %s4290_s13  ;;  %s4308_s8 = scalar_lea.sflag [#allocation5], %s285_s15 }
  0x3e   : > { %5136 = sst [smem:[#allocation26_spill]] %s4296_s6  ;;  %s296_s22 = sshll.u32 %s289_s20, 4  ;;  %s4306_s22 = int_to_ptr.vmem [resolvable:$true] %s296_s22 }
  0x3f   : > { %p4314_p7 = pneg %p4244_p6 }
  0x41   : > { %s4303_s9 = scalar_lea.hbm %s5137_s2, %s5108_s24  ;;  %s3839_s10 = scalar_lea.hbm %s5137_s2, 12288 }
  0x42   : > { %s3834_s21 = scalar_lea.hbm %s4303_s9, 6144  ;;  %p3840_p12 = scmp.lt.u32.totalorder %s4303_s9, %s5137_s2 }
  0x43   : > { %p3835_p4 = scmp.ne.s32.totalorder %s4303_s9, %s3834_s21  ;;  %p3841_p0 = scmp.lt.u32.totalorder %s3839_s10, %s3834_s21 }
  0x44   : > { %s5138_s12 = scalar_select %p4314_p7, 1, 0 }
  0x45   : > { %p3837_p8 = pnand %p4314_p7, %p3835_p4  ;;  %p3842_p10 = por %p3841_p0, %p3840_p12 }
  0x46   : > { %p3843_p1 = scmp.lt.u32.totalorder %s3834_s21, %s4303_s9 }
  0x47   : > { %p3838_p9 = pneg %p3837_p8 }
  0x48   : > { %p3844_p11 = por %p3843_p1, %p3842_p10 }
  0x4a   : > { %p3845_p5 = pnand %p3844_p11, %p3838_p9 }
  0x4c   : > { %3848 = shalt.err (!%p3845_p5)
}
  0x4d   : > { %s3849_s15 = scalar_lea.vmem %s4306_s22, 6144  ;;  %s4107_s23 = smov [#allocation9]  }
  0x4e   : > { %p3850_p3 = scmp.ne.s32.totalorder %s4306_s22, %s3849_s15  ;;  %s3854_s16 = sshll.u32 %s4107_s23, 4  ;;  %s3855_s16 = int_to_ptr.vmem [resolvable:$false] %s3854_s16 }
  0x4f   : > { %s3856_s24 = scalar_lea.vmem %s3855_s16, 12288  ;;  %p3857_p13 = scmp.lt.s32.totalorder %s4306_s22, %s3855_s16 }
  0x50   : > { %p3852_p4 = pnand %p3850_p3, %p4314_p7  ;;  %p3858_p2 = scmp.lt.s32.totalorder %s3856_s24, %s3849_s15 }
  0x52   : > { %p3853_p8 = pneg %p3852_p4  ;;  %p3859_p12 = por %p3858_p2, %p3857_p13 }
  0x54   : > { %p3860_p0 = pnand %p3859_p12, %p3853_p8 }
  0x56   : > { %3863 = shalt.err (!%p3860_p0)
}
  0x57   : > { %s4108_s10 = smov 384   ;;  %s4109_s21 = smov 24  }
  0x58   : > { %3642 = dma.hbm_to_vmem [thread:$0]  (!%p4244_p6), %s4303_s9, 6144, %s4306_s22, %s4308_s8, %s4108_s10, %s4108_s10, %s4109_s21  }
  0x59   : > { %s5139_s20 = smul.u32 6144, %s4098_s28  ;;  %s310_s24 = scalar_lea.vmem [#allocation10], %s4290_s13 }
  0x5a   : > { %s317_s0 = sshll.u32 %s310_s24, 4  ;;  %s5140_s2 = sand.u32 1, %s4090_s26   ;;  %s4353_s0 = int_to_ptr.vmem [resolvable:$true] %s317_s0 }
  0x5b   : > { %s4346_s16 = scalar_lea.hbm %s5092_s3, %s5139_s20  ;;  %s4351_s19 = smul.u32 3, %s5140_s2 }
  0x5c   : > { %s3605_s6 = smul.u32 48, %s4098_s28  ;;  %s3864_s29 = scalar_lea.hbm %s4346_s16, 6144 }
  0x5d   : > { %p3865_p2 = scmp.ne.s32.totalorder %s4346_s16, %s3864_s29  ;;  %s3869_s20 = scalar_lea.hbm %s5092_s3, 12288 }
  0x5e   : > { %p3870_p10 = scmp.lt.u32.totalorder %s4346_s16, %s5092_s3  ;;  %p3871_p1 = scmp.lt.u32.totalorder %s3869_s20, %s3864_s29 }
  0x5f   : > { %p3867_p13 = pnand %p3865_p2, %p4314_p7  ;;  %p3873_p5 = scmp.lt.u32.totalorder %s3864_s29, %s4346_s16 }
  0x60   : > { %p3872_p11 = por %p3871_p1, %p3870_p10 }
  0x61   : > { %p3868_p9 = pneg %p3867_p13 }
  0x62   : > { %p3874_p3 = por %p3873_p5, %p3872_p11 }
  0x64   : > { %p3875_p4 = pnand %p3874_p3, %p3868_p9 }
  0x66   : > { %3878 = shalt.err (!%p3875_p4)
}
  0x67   : > { %s3879_s2 = scalar_lea.vmem %s4353_s0, 6144  ;;  %s4110_s13 = smov [#allocation10]  }
  0x68   : > { %p3880_p8 = scmp.ne.s32.totalorder %s4353_s0, %s3879_s2  ;;  %s3884_s24 = sshll.u32 %s4110_s13, 4  ;;  %s3885_s24 = int_to_ptr.vmem [resolvable:$false] %s3884_s24 }
  0x69   : > { %s3886_s9 = scalar_lea.vmem %s3885_s24, 12288  ;;  %p3887_p2 = scmp.lt.s32.totalorder %s4353_s0, %s3885_s24 }
  0x6a   : > { %p3882_p12 = pnand %p3880_p8, %p4314_p7  ;;  %p3888_p13 = scmp.lt.s32.totalorder %s3886_s9, %s3879_s2 }
  0x6c   : > { %p3883_p0 = pneg %p3882_p12  ;;  %p3889_p10 = por %p3888_p13, %p3887_p2 }
  0x6e   : > { %p3890_p1 = pnand %p3889_p10, %p3883_p0 }
  0x70   : > { %3893 = shalt.err (!%p3890_p1)
}
  0x71   : > { %3645 = dma.hbm_to_vmem [thread:$0]  (!%p4244_p6), %s4346_s16, 6144, %s4353_s0, %s4308_s8, %s4108_s10, %s4108_s10, %s4109_s21  }
  0x72   : > { %s4386_s20 = scalar_lea.hbm %s5093_s4, %s3605_s6  ;;  %s331_s15 = scalar_lea.vmem [#allocation11], %s4351_s19 }
  0x73   : > { %s339_s23 = sshll.u32 %s331_s15, 4  ;;  %s4111_s2 = smov [#allocation7]   ;;  %s4389_s23 = int_to_ptr.vmem [resolvable:$true] %s339_s23 }
  0x74   : > { %s274_s13 = sshll.u32 %s4111_s2, 4  ;;  %s3894_s24 = scalar_lea.hbm %s4386_s20, 48  ;;  %s275_s13 = int_to_ptr.vmem [resolvable:$true] %s274_s13 }
  0x75   : > { %p3895_p9 = scmp.ne.s32.totalorder %s4386_s20, %s3894_s24  ;;  %s3899_s21 = scalar_lea.hbm %s5093_s4, 96 }
  0x76   : > { %p3900_p3 = scmp.lt.u32.totalorder %s4386_s20, %s5093_s4  ;;  %p3901_p4 = scmp.lt.u32.totalorder %s3899_s21, %s3894_s24 }
  0x77   : > { %p3897_p11 = pnand %p3895_p9, %p4314_p7  ;;  %p3903_p12 = scmp.lt.u32.totalorder %s3894_s24, %s4386_s20 }
  0x78   : > { %p3902_p8 = por %p3901_p4, %p3900_p3 }
  0x79   : > { %p3898_p5 = pneg %p3897_p11 }
  0x7a   : > { %p3904_p0 = por %p3903_p12, %p3902_p8 }
  0x7c   : > { %p3905_p2 = pnand %p3904_p0, %p3898_p5 }
  0x7e   : > { %3908 = shalt.err (!%p3905_p2)
}
  0x7f   : > { %s3909_s29 = scalar_lea.vmem %s4389_s23, 48  ;;  %s4112_s22 = smov [#allocation11]  }
  0x80   : > { %p3910_p13 = scmp.ne.s32.totalorder %s4389_s23, %s3909_s29  ;;  %s3914_s15 = sshll.u32 %s4112_s22, 4  ;;  %s3915_s15 = int_to_ptr.vmem [resolvable:$false] %s3914_s15 }
  0x81   : > { %s3916_s2 = scalar_lea.vmem %s3915_s15, 96  ;;  %p3917_p9 = scmp.lt.s32.totalorder %s4389_s23, %s3915_s15 }
  0x82   : > { %p3912_p10 = pnand %p3910_p13, %p4314_p7  ;;  %p3918_p11 = scmp.lt.s32.totalorder %s3916_s2, %s3909_s29 }
  0x84   : > { %p3913_p1 = pneg %p3912_p10  ;;  %p3919_p3 = por %p3918_p11, %p3917_p9 }
  0x86   : > { %p3920_p4 = pnand %p3919_p3, %p3913_p1 }
  0x88   : > { %3923 = shalt.err (!%p3920_p4)
}
  0x89   : > { %3648 = dma.hbm_to_vmem [thread:$0]  (!%p4244_p6), %s4386_s20, 48, %s4389_s23, %s4308_s8  }
  0x8a   : > { %s3924_s10 = scalar_lea.hbm %s5090_s1, 128  ;;  %p5141_p8 = scmp.ne.s32.totalorder %s5130_s17, 0 }
  0x8b   : > { %p3925_p5 = scmp.ne.s32.totalorder %s5090_s1, %s3924_s10  ;;  %p3931_p13 = scmp.lt.u32.totalorder %s3924_s10, %s5090_s1 }
  0x8c   : > { %p5142_p12 = pneg %p5141_p8 }
  0x8e   : > { %p3927_p0 = pnand %p3925_p5, %p5142_p12 }
  0x90   : > { %p3928_p2 = pneg %p3927_p0 }
  0x92   : > { %p3933_p10 = pnand %p3931_p13, %p3928_p2 }
  0x94   : > { %3936 = shalt.err (!%p3933_p10)
}
  0x95   : > { %s3937_s20 = scalar_lea.vmem %s275_s13, 128  ;;  %p5143_p9 = pmov %p5142_p12 }
  0x96   : > { %p3938_p1 = scmp.ne.s32.totalorder %s275_s13, %s3937_s20  ;;  %p3945_p4 = scmp.lt.s32.totalorder %s275_s13, %s275_s13 }
  0x97   : > { %p3946_p6 = scmp.lt.s32.totalorder %s3937_s20, %s3937_s20 }
  0x98   : > { %p3940_p11 = pnand %p3938_p1, %p5143_p9 }
  0x99   : > { %p3947_p7 = por %p3946_p6, %p3945_p4 }
  0x9a   : > { %p3941_p3 = pneg %p3940_p11 }
  0x9c   : > { %p3948_p5 = pnand %p3947_p7, %p3941_p3 }
  0x9e   : > { %3951 = shalt.err (!%p3948_p5)
}
  0x9f   : > { %3638 = dma.hbm_to_vmem [thread:$0]  (!%p5141_p8), %s5090_s1, 128, %s275_s13, [#allocation8]  }
  0xa0   : > { %s4438_s24 = scalar_lea.hbm %s5094_s5, %s3605_s6  ;;  %s350_s0 = scalar_lea.vmem [#allocation12], %s4351_s19 }
  0xa1   : > { %s358_s10 = sshll.u32 %s350_s0, 4  ;;  %s3952_s17 = scalar_lea.hbm %s4438_s24, 48  ;;  %s359_s10 = int_to_ptr.vmem [resolvable:$true] %s358_s10 }
  0xa2   : > { %p3953_p6 = scmp.ne.s32.totalorder %s4438_s24, %s3952_s17  ;;  %p5144_p7 = scmp.ne.s32.totalorder %s5138_s12, 0 }
  0xa3   : > { %s3957_s16 = scalar_lea.hbm %s5094_s5, 96  ;;  %p3958_p8 = scmp.lt.u32.totalorder %s4438_s24, %s5094_s5 }
  0xa4   : > { %p3955_p12 = pnand %p3953_p6, %p5144_p7  ;;  %p3959_p2 = scmp.lt.u32.totalorder %s3957_s16, %s3952_s17 }
  0xa5   : > { %p3961_p10 = scmp.lt.u32.totalorder %s3952_s17, %s4438_s24 }
  0xa6   : > { %p3956_p0 = pneg %p3955_p12  ;;  %p3960_p13 = por %p3959_p2, %p3958_p8 }
  0xa8   : > { %p3962_p1 = por %p3961_p10, %p3960_p13 }
  0xaa   : > { %p3963_p9 = pnand %p3962_p1, %p3956_p0 }
  0xac   : > { %3966 = shalt.err (!%p3963_p9)
}
  0xad   : > { %s3967_s6 = scalar_lea.vmem %s359_s10, 48  ;;  %s4113_s19 = smov [#allocation12]  }
  0xae   : > { %p3968_p11 = scmp.ne.s32.totalorder %s359_s10, %s3967_s6  ;;  %s3972_s20 = sshll.u32 %s4113_s19, 4  ;;  %s3973_s20 = int_to_ptr.vmem [resolvable:$false] %s3972_s20 }
  0xaf   : > { %s3974_s23 = scalar_lea.vmem %s3973_s20, 96  ;;  %p3975_p5 = scmp.lt.s32.totalorder %s359_s10, %s3973_s20 }
  0xb0   : > { %p3970_p3 = pnand %p3968_p11, %p5144_p7  ;;  %p3976_p6 = scmp.lt.s32.totalorder %s3974_s23, %s3967_s6 }
  0xb2   : > { %p3971_p4 = pneg %p3970_p3  ;;  %p3977_p12 = por %p3976_p6, %p3975_p5 }
  0xb4   : > { %p3978_p2 = pnand %p3977_p12, %p3971_p4 }
  0xb6   : > { %3981 = shalt.err (!%p3978_p2)
}
  0xb7   : > { %p5145_p8 = scmp.ne.s32.totalorder %s5131_s18, 0  ;;  %p5146_p0 = scmp.ne.s32.totalorder %s5129_s14, 0 }
  0xb8   : > { %p5147_p7 = scmp.eq.s32.totalorder (!%p5146_p0), %s4193_s30, 0 }
  0xb9   : > { %3651 = dma.hbm_to_vmem [thread:$0]  (!%p5145_p8), %s4438_s24, 48, %s359_s10, %s4308_s8  }
  0xba   : > { %367 = sbr.rel (%p5146_p0) target bundleno = 2416 (0x970), region = 44 }
  0xc1   : > { %4061 = dma.done.wait (%p5147_p7), [#allocation5], 1024   ;;  %p5148_p13 = pmov %p5147_p7 }
  0xc2   : > { %p5149_p10 = pmov %p5147_p7 }
  0xc3   : > { %4063 = vsyncadd (%p5148_p13), [#allocation5], 4294966272 }
  0xc4   : > { %4065 = dma.done.wait (%p5149_p10), [#allocation8], 128   ;;  %p5150_p1 = pmov %p5147_p7 }
  0xc5   : > { %s377_s18 = sand.u32 1, %s4193_s30   ;;  %s4471_s8 = sand.u32 1, %s4086_s25  }
  0xc6   : > { %4067 = vsyncadd (%p5150_p1), [#allocation8], 4294967168  ;;  %s3608_s14 = smul.u32 384, %s4471_s8  ;;  %s378_s12 = scalar_lea.sflag [#allocation5], %s377_s18 }
  0xc7   : > { %p5151_p9 = scmp.ne.s32.totalorder %s5124_s11, 0 }
  0xc8   : > { %s4474_s22 = scalar_lea.vmem [#allocation9], %s3608_s14 }
  0xc9   : > { %4069 = dma.done.wait (%p5151_p9), %s378_s12, 12384  }
  0xca   : > { %4071 = vsyncadd (%p5151_p9), %s378_s12, 4294954912  ;;  %s3609_s15 = smul.u32 3, %s4471_s8  ;;  %s2532_s2 = sshll.u32 %s4471_s8, 3 }
  0xcb   : > { %s4482_s24 = scalar_lea.vmem [#allocation10], %s3608_s14  ;;  %s4488_s17 = scalar_lea.vmem [#allocation14], %s2532_s2 }
  0xcc   : > { %s4484_s0 = scalar_lea.vmem [#allocation11], %s3609_s15  ;;  %s4486_s10 = scalar_lea.vmem [#allocation12], %s3609_s15 }
  0xcd   : > { %p2533_p11 = scmp.ne.s32.totalorder %s4094_s27, 0 }
  0xce   : > { %v466_v0 = vld [vmem:[#allocation7] sm:$0xff] (!%p2533_p11)  ;;  %v472_v1 = vlaneseq (!%p2533_p11)  ;;  %v4114_v2 = vmov (!%p2533_p11), 1966171168   ;;  %v459_v21 = vld [vmem:[#allocation4 + $0x8] sm:$0xff] (!%p2533_p11)  ;;  %v460_v22 = vld [vmem:[#allocation4 + $0x10] sm:$0xff] (!%p2533_p11) }
  0xcf   : > { %457 = sbr.rel (%p2533_p11) target bundleno = 227 (0xe3), region = 72  ;;  %v470_v3 = vunpack.c.l.s4 (!%p2533_p11), %v4114_v2  ;;  %v468_v6 = vcombine.high (!%p2533_p11), %v466_v0, %v466_v0  ;;  %v458_v15 = vld [vmem:[#allocation4] sm:$0xff] (!%p2533_p11)  ;;  %v463_v29 = vld [vmem:[#allocation4 + $0x28] sm:$0xff] (!%p2533_p11)  ;;  %v464_v30 = vld [vmem:[#allocation4 + $0x30] sm:$0xff] (!%p2533_p11) }
  0xd0   : > { %v473_v4 = vshrl.u32 (!%p2533_p11), %v472_v1, 7  ;;  %v462_v19 = vld [vmem:[#allocation4 + $0x20] sm:$0xff] (!%p2533_p11)  ;;  %v461_v31 = vld [vmem:[#allocation4 + $0x18] sm:$0xff] (!%p2533_p11) }
  0xd1   : > { %v471_v5 = vunpack.c.0.s8 (!%p2533_p11), %v470_v3  ;;  %v465_v39 = vld [vmem:[#allocation4 + $0x38] sm:$0xff] (!%p2533_p11) }
  0xd2   : > { %v519_v9 = vsub.s32 (!%p2533_p11), 0, %v473_v4 }
  0xd3   : > { %v474_v7 = vsub.s32 (!%p2533_p11), %v471_v5, %v473_v4 }
  0xd5   : > { %v475_v8 = vrot.slane (!%p2533_p11), %v466_v0, %v474_v7  ;;  %v482_v10 = vrot.slane (!%p2533_p11), %v468_v6, %v474_v7 }
  0xd7   : > { %v491_v11 = vrot.slane %v475_v8, %v474_v7  ;;  %v483_v12 = vcombine.high %v475_v8, %v475_v8  ;;  %v498_v13 = vrot.slane %v482_v10, %v474_v7  ;;  %v484_v14 = vcombine.high %v482_v10, %v482_v10 }
  0xd9   : > { %v520_v16 = vrot.slane %v491_v11, %v519_v9  ;;  %v505_v17 = vrot.slane %v483_v12, %v474_v7  ;;  %v513_v18 = vcombine.high %v491_v11, %v491_v11  ;;  %v536_v20 = vrot.slane %v498_v13, %v519_v9 }
  0xda   : > { %v512_v23 = vrot.slane %v484_v14, %v474_v7  ;;  %v514_v24 = vcombine.high %v498_v13, %v498_v13 }
  0xdb   : > { %v557_v25 = vadd.f32 %v520_v16, %v458_v15  ;;  %v524_v26 = vrot.slane %v505_v17, %v519_v9  ;;  %v528_v27 = vrot.slane %v513_v18, %v519_v9  ;;  %v515_v28 = vcombine.high %v505_v17, %v505_v17 }
  0xdc   : > { %v561_v32 = vadd.f32 %v536_v20, %v462_v19  ;;  %v540_v33 = vrot.slane %v512_v23, %v519_v9  ;;  %v544_v34 = vrot.slane %v514_v24, %v519_v9  ;;  %v516_v35 = vcombine.high %v512_v23, %v512_v23 }
  0xdd   : > { %565 = vst [vmem:[#allocation13] sm:$0xff] %v557_v25  ;;  %v558_v36 = vadd.f32 %v524_v26, %v459_v21  ;;  %v559_v37 = vadd.f32 %v528_v27, %v460_v22  ;;  %v532_v38 = vrot.slane %v515_v28, %v519_v9 }
  0xde   : > { %569 = vst [vmem:[#allocation13 + $0x20] sm:$0xff] %v561_v32  ;;  %v562_v40 = vadd.f32 %v540_v33, %v463_v29  ;;  %v563_v41 = vadd.f32 %v544_v34, %v464_v30  ;;  %v548_v42 = vrot.slane %v516_v35, %v519_v9 }
  0xdf   : > { %566 = vst [vmem:[#allocation13 + $0x8] sm:$0xff] %v558_v36  ;;  %567 = vst [vmem:[#allocation13 + $0x10] sm:$0xff] %v559_v37  ;;  %v560_v43 = vadd.f32 %v532_v38, %v461_v31 }
  0xe0   : > { %570 = vst [vmem:[#allocation13 + $0x28] sm:$0xff] %v562_v40  ;;  %571 = vst [vmem:[#allocation13 + $0x30] sm:$0xff] %v563_v41  ;;  %v564_v44 = vadd.f32 %v548_v42, %v465_v39 }
  0xe1   : > { %568 = vst [vmem:[#allocation13 + $0x18] sm:$0xff] %v560_v43 }
  0xe2   : > { %572 = vst [vmem:[#allocation13 + $0x38] sm:$0xff] %v564_v44 }
  0xe3 PF: > { %v575_v45 = vld [vmem:[%s4474_s22 + $0x8] sm:$0xff]  ;;  %v578_v46 = vld [vmem:[%s4474_s22 + $0x20] sm:$0xff]  ;;  %v577_v49 = vld [vmem:[%s4474_s22 + $0x18] sm:$0xff]  ;;  %v4115_v52 = vmov 0.0   ;;  %vm4117_vm0 = vmmov 0   ;;  %s4118_s11 = smov [#allocation13]  }
  0xe4   : > { %v574_v47 = vld [vmem:[%s4474_s22] sm:$0xff]  ;;  %v3040_v48 = vpack.c.bf16 %v578_v46, %v575_v45  ;;  %v581_v50 = vld [vmem:[%s4474_s22 + $0x38] sm:$0xff]  ;;  %v584_v51 = vld [vmem:[%s4474_s22 + $0x50] sm:$0xff]  ;;  %776 = vmatprep.mubr.f32.mxu0 %v4115_v52  ;;  %s2327_s21 = sshll.u32 %s4118_s11, 4  ;;  %s2552_s13 = sshll.u32 %s4094_s27, 7  ;;  %s2328_s21 = int_to_ptr.vmem [resolvable:$true] %s2327_s21 }
  0xe5   : > { %v3042_v53 = vpack.c.bf16 %v577_v49, %v574_v47  ;;  %v3044_v54 = vpack.c.bf16 %v584_v51, %v581_v50  ;;  %v580_v55 = vld [vmem:[%s4474_s22 + $0x30] sm:$0xff]  ;;  %v583_v56 = vld [vmem:[%s4474_s22 + $0x48] sm:$0xff]  ;;  %v590_v58 = vld [vmem:[%s4474_s22 + $0x80] sm:$0xff]  ;;  %s2344_s16 = sshll.u32 %s4488_s17, 4  ;;  %s5017_s6 = scalar_lea.hbm %s5096_s7, %s2552_s13  ;;  %s5019_s16 = int_to_ptr.vmem [resolvable:$true] %s2344_s16 }
  0xe6   : > { %v587_v57 = vld [vmem:[%s4474_s22 + $0x68] sm:$0xff]  ;;  %3041 = vmatprep.subr.bf16.mxu0 %v3040_v48  ;;  %v3046_v59 = vpack.c.bf16 %v583_v56, %v580_v55  ;;  %v586_v61 = vld [vmem:[%s4474_s22 + $0x60] sm:$0xff]  ;;  %v589_v62 = vld [vmem:[%s4474_s22 + $0x78] sm:$0xff]  ;;  %s3982_s19 = scalar_lea.vmem %s2328_s21, 1024  ;;  %p5152_p4 = scmp.eq.s32.totalorder %s4193_s30, 1 }
  0xe7   : > { %3043 = vmatpush1.bf16.msra.mxu0 %v3042_v53  ;;  %v3048_v60 = vpack.c.bf16 %v590_v58, %v587_v57  ;;  %v593_v63 = vld [vmem:[%s4474_s22 + $0x98] sm:$0xff]  ;;  %v596_v0 = vld [vmem:[%s4474_s22 + $0xb0] sm:$0xff]  ;;  %v3050_v1 = vpack.c.bf16 %v589_v62, %v586_v61  ;;  %v595_v4 = vld [vmem:[%s4474_s22 + $0xa8] sm:$0xff]  ;;  %p3983_p3 = scmp.ne.s32.totalorder %s2328_s21, %s3982_s19  ;;  %p3989_p12 = scmp.lt.s32.totalorder %s2328_s21, %s2328_s21 }
  0xe8   : > { %3045 = vmatprep.subr.bf16.mxu0 %v3044_v54  ;;  %v592_v2 = vld [vmem:[%s4474_s22 + $0x90] sm:$0xff]  ;;  %v3052_v3 = vpack.c.bf16 %v596_v0, %v593_v63  ;;  %v579_v6 = vld [vmem:[%s4474_s22 + $0x28] sm:$0xff]  ;;  %v602_v8 = vld [vmem:[%s4474_s22 + $0xe0] sm:$0xff]  ;;  %p3990_p2 = scmp.lt.s32.totalorder %s3982_s19, %s3982_s19 }
  0xe9   : > { %v576_v5 = vld [vmem:[%s4474_s22 + $0x10] sm:$0xff]  ;;  %v599_v7 = vld [vmem:[%s4474_s22 + $0xc8] sm:$0xff]  ;;  %v582_v10 = vld [vmem:[%s4474_s22 + $0x40] sm:$0xff]  ;;  %v3054_v12 = vpack.c.bf16 %v595_v4, %v592_v2  ;;  %p3984_p5 = pnand %p3983_p3, %p5152_p4 }
  0xea   : > { %v3072_v9 = vpack.c.bf16 %v579_v6, %v576_v5  ;;  %v585_v11 = vld [vmem:[%s4474_s22 + $0x58] sm:$0xff]  ;;  %v598_v13 = vld [vmem:[%s4474_s22 + $0xc0] sm:$0xff]  ;;  %v3056_v15 = vpack.c.bf16 %v602_v8, %v599_v7  ;;  %v4516_v17 = vld [vmem:[#allocation13] sm:$0xff]  ;;  %p3991_p8 = por %p3990_p2, %p3989_p12 }
  0xeb   : > { %3047 = vmatpush1.bf16.msra.mxu0 %v3046_v59  ;;  %v3076_v14 = vpack.c.bf16 %v585_v11, %v582_v10  ;;  %v601_v16 = vld [vmem:[%s4474_s22 + $0xd8] sm:$0xff]  ;;  %v588_v18 = vld [vmem:[%s4474_s22 + $0x70] sm:$0xff]  ;;  %v591_v21 = vld [vmem:[%s4474_s22 + $0x88] sm:$0xff]  ;;  %2748 = vmatprep.mubr.f32.mxu1 %v4516_v17  ;;  %p3985_p6 = pneg %p3984_p5 }
  0xec   : > { %3049 = vmatprep.subr.bf16.mxu0 %v3048_v60  ;;  %3073 = vmatprep.subr.bf16.mxu1 %v3072_v9  ;;  %v605_v19 = vld [vmem:[%s4474_s22 + $0xf8] sm:$0xff]  ;;  %v608_v20 = vld [vmem:[%s4474_s22 + $0x110] sm:$0xff]  ;;  %v3080_v22 = vpack.c.bf16 %v591_v21, %v588_v18  ;;  %v3058_v23 = vpack.c.bf16 %v601_v16, %v598_v13  ;;  %v594_v24 = vld [vmem:[%s4474_s22 + $0xa0] sm:$0xff]  ;;  %v4116_v21 = vmov 0.0|0.0  }
  0xed   : > { %3075 = vmatpush3.bf16.msra.mxu1 %v3072_v9  ;;  %v597_v25 = vld [vmem:[%s4474_s22 + $0xb8] sm:$0xff]  ;;  %v3060_v26 = vpack.c.bf16 %v608_v20, %v605_v19  ;;  %v604_v27 = vld [vmem:[%s4474_s22 + $0xf0] sm:$0xff]  ;;  %v607_v28 = vld [vmem:[%s4474_s22 + $0x108] sm:$0xff]  ;;  %p3992_p0 = pnand %p3991_p8, %p3985_p6 }
  0xee   : > { %3077 = vmatprep.subr.bf16.mxu1 %v3076_v14  ;;  %v611_v29 = vld [vmem:[%s4474_s22 + $0x128] sm:$0xff]  ;;  %v614_v30 = vld [vmem:[%s4474_s22 + $0x140] sm:$0xff]  ;;  %v3084_v31 = vpack.c.bf16 %v597_v25, %v594_v24  ;;  %v600_v32 = vld [vmem:[%s4474_s22 + $0xd0] sm:$0xff]  ;;  %v3062_v34 = vpack.c.bf16 %v607_v28, %v604_v27 }
  0xef   : > { %3051 = vmatpush1.bf16.msra.mxu0 %v3050_v1  ;;  %v603_v33 = vld [vmem:[%s4474_s22 + $0xe8] sm:$0xff]  ;;  %v3064_v35 = vpack.c.bf16 %v614_v30, %v611_v29  ;;  %v610_v36 = vld [vmem:[%s4474_s22 + $0x120] sm:$0xff]  ;;  %v613_v37 = vld [vmem:[%s4474_s22 + $0x138] sm:$0xff] }
  0xf0   : > { %3053 = vmatprep.subr.bf16.mxu0 %v3052_v3  ;;  %v617_v38 = vld [vmem:[%s4474_s22 + $0x158] sm:$0xff]  ;;  %v620_v39 = vld [vmem:[%s4474_s22 + $0x170] sm:$0xff]  ;;  %v3088_v40 = vpack.c.bf16 %v603_v33, %v600_v32  ;;  %v606_v41 = vld [vmem:[%s4474_s22 + $0x100] sm:$0xff]  ;;  %v3066_v43 = vpack.c.bf16 %v613_v37, %v610_v36 }
  0xf1   : > { %3079 = vmatpush3.bf16.msra.mxu1 %v3076_v14  ;;  %v609_v42 = vld [vmem:[%s4474_s22 + $0x118] sm:$0xff]  ;;  %v3068_v44 = vpack.c.bf16 %v620_v39, %v617_v38  ;;  %v616_v45 = vld [vmem:[%s4474_s22 + $0x150] sm:$0xff]  ;;  %v619_v46 = vld [vmem:[%s4474_s22 + $0x168] sm:$0xff] }
  0xf2   : > { %3081 = vmatprep.subr.bf16.mxu1 %v3080_v22  ;;  %v623_v47 = vld [vmem:[%s4482_s24 + $0x8] sm:$0xff]  ;;  %v626_v48 = vld [vmem:[%s4482_s24 + $0x20] sm:$0xff]  ;;  %v3092_v49 = vpack.c.bf16 %v609_v42, %v606_v41  ;;  %v612_v50 = vld [vmem:[%s4474_s22 + $0x130] sm:$0xff]  ;;  %v3070_v53 = vpack.c.bf16 %v619_v46, %v616_v45 }
  0xf3   : > { %3055 = vmatpush1.bf16.msra.mxu0 %v3054_v12  ;;  %v615_v51 = vld [vmem:[%s4474_s22 + $0x148] sm:$0xff]  ;;  %v4543_v54 = vpack.c.bf16 %v626_v48, %v623_v47  ;;  %v622_v55 = vld [vmem:[%s4482_s24] sm:$0xff]  ;;  %v625_v56 = vld [vmem:[%s4482_s24 + $0x18] sm:$0xff] }
  0xf4   : > { %3057 = vmatprep.subr.bf16.mxu0 %v3056_v15  ;;  %v629_v57 = vld [vmem:[%s4482_s24 + $0x38] sm:$0xff]  ;;  %v632_v58 = vld [vmem:[%s4482_s24 + $0x50] sm:$0xff]  ;;  %v3096_v59 = vpack.c.bf16 %v615_v51, %v612_v50  ;;  %v618_v60 = vld [vmem:[%s4474_s22 + $0x160] sm:$0xff]  ;;  %v4551_v62 = vpack.c.bf16 %v625_v56, %v622_v55 }
  0xf5   : > { %3083 = vmatpush3.bf16.msra.mxu1 %v3080_v22  ;;  %v621_v61 = vld [vmem:[%s4474_s22 + $0x178] sm:$0xff]  ;;  %v4554_v63 = vpack.c.bf16 %v632_v58, %v629_v57  ;;  %v628_v0 = vld [vmem:[%s4482_s24 + $0x30] sm:$0xff]  ;;  %v631_v1 = vld [vmem:[%s4482_s24 + $0x48] sm:$0xff] }
  0xf6   : > { %3085 = vmatprep.subr.bf16.mxu1 %v3084_v31  ;;  %v635_v2 = vld [vmem:[%s4482_s24 + $0x68] sm:$0xff]  ;;  %v638_v3 = vld [vmem:[%s4482_s24 + $0x80] sm:$0xff]  ;;  %v3100_v4 = vpack.c.bf16 %v621_v61, %v618_v60  ;;  %v705_v5 = vld [vmem:[#allocation13 + $0x8] sm:$0xff]  ;;  %v4563_v6 = vpack.c.bf16 %v631_v1, %v628_v0 }
  0xf7   : > { %3059 = vmatpush1.bf16.msra.mxu0 %v3058_v23  ;;  %v4566_v7 = vpack.c.bf16 %v638_v3, %v635_v2  ;;  %v634_v8 = vld [vmem:[%s4482_s24 + $0x60] sm:$0xff]  ;;  %v637_v9 = vld [vmem:[%s4482_s24 + $0x78] sm:$0xff]  ;;  %v644_v11 = vld [vmem:[%s4482_s24 + $0xb0] sm:$0xff] }
  0xf8   : > { %3061 = vmatprep.subr.bf16.mxu0 %v3060_v26  ;;  %v641_v10 = vld [vmem:[%s4482_s24 + $0x98] sm:$0xff]  ;;  %v624_v12 = vld [vmem:[%s4482_s24 + $0x10] sm:$0xff]  ;;  %v627_v13 = vld [vmem:[%s4482_s24 + $0x28] sm:$0xff]  ;;  %v4576_v15 = vpack.c.bf16 %v637_v9, %v634_v8 }
  0xf9   : > { %3087 = vmatpush3.bf16.msra.mxu1 %v3084_v31  ;;  %v706_v14 = vld [vmem:[#allocation13 + $0x10] sm:$0xff]  ;;  %v4579_v16 = vpack.c.bf16 %v644_v11, %v641_v10  ;;  %v643_v18 = vld [vmem:[%s4482_s24 + $0xa8] sm:$0xff]  ;;  %v4586_v22 = vpack.c.bf16 %v627_v13, %v624_v12  ;;  %v656_v31 = vld [vmem:[%s4482_s24 + $0x110] sm:$0xff] }
  0xfa   : > { %3089 = vmatprep.subr.bf16.mxu1 %v3088_v40  ;;  %v647_v19 = vld [vmem:[%s4482_s24 + $0xc8] sm:$0xff]  ;;  %v650_v20 = vld [vmem:[%s4482_s24 + $0xe0] sm:$0xff]  ;;  %v633_v24 = vld [vmem:[%s4482_s24 + $0x58] sm:$0xff] }
  0xfb   : > { %3063 = vmatpush1.bf16.msra.mxu0 %v3062_v34  ;;  %v630_v23 = vld [vmem:[%s4482_s24 + $0x40] sm:$0xff]  ;;  %v4595_v27 = vpack.c.bf16 %v650_v20, %v647_v19  ;;  %v649_v29 = vld [vmem:[%s4482_s24 + $0xd8] sm:$0xff]  ;;  %v636_v33 = vld [vmem:[%s4482_s24 + $0x70] sm:$0xff] }
  0xfc   : > { %3065 = vmatprep.subr.bf16.mxu0 %v3064_v35  ;;  %v707_v25 = vld [vmem:[#allocation13 + $0x18] sm:$0xff]  ;;  %v653_v30 = vld [vmem:[%s4482_s24 + $0xf8] sm:$0xff]  ;;  %v4602_v32 = vpack.c.bf16 %v633_v24, %v630_v23  ;;  %v708_v35 = vld [vmem:[#allocation13 + $0x20] sm:$0xff] }
  0xfd   : > { %3091 = vmatpush3.bf16.msra.mxu1 %v3088_v40  ;;  %v646_v28 = vld [vmem:[%s4482_s24 + $0xc0] sm:$0xff]  ;;  %v639_v34 = vld [vmem:[%s4482_s24 + $0x88] sm:$0xff]  ;;  %v4612_v37 = vpack.c.bf16 %v656_v31, %v653_v30  ;;  %v652_v38 = vld [vmem:[%s4482_s24 + $0xf0] sm:$0xff] }
  0xfe   : > { %3093 = vmatprep.subr.bf16.mxu1 %v3092_v49  ;;  %v4609_v36 = vpack.c.bf16 %v649_v29, %v646_v28  ;;  %v655_v39 = vld [vmem:[%s4482_s24 + $0x108] sm:$0xff]  ;;  %v662_v41 = vld [vmem:[%s4482_s24 + $0x140] sm:$0xff]  ;;  %v4619_v42 = vpack.c.bf16 %v639_v34, %v636_v33  ;;  %v709_v45 = vld [vmem:[#allocation13 + $0x28] sm:$0xff] }
  0xff   : > { %3067 = vmatpush1.bf16.msra.mxu0 %v3066_v43  ;;  %v659_v40 = vld [vmem:[%s4482_s24 + $0x128] sm:$0xff]  ;;  %v642_v43 = vld [vmem:[%s4482_s24 + $0xa0] sm:$0xff]  ;;  %v4626_v46 = vpack.c.bf16 %v655_v39, %v652_v38  ;;  %v661_v50 = vld [vmem:[%s4482_s24 + $0x138] sm:$0xff] }
 0x100   : > { %3069 = vmatprep.subr.bf16.mxu0 %v3068_v44  ;;  %v645_v44 = vld [vmem:[%s4482_s24 + $0xb8] sm:$0xff]  ;;  %v4629_v48 = vpack.c.bf16 %v662_v41, %v659_v40  ;;  %v648_v56 = vld [vmem:[%s4482_s24 + $0xd0] sm:$0xff]  ;;  %v651_v57 = vld [vmem:[%s4482_s24 + $0xe8] sm:$0xff] }
 0x101   : > { %3095 = vmatpush3.bf16.msra.mxu1 %v3092_v49  ;;  %v710_v47 = vld [vmem:[#allocation13 + $0x30] sm:$0xff]  ;;  %v4636_v55 = vpack.c.bf16 %v645_v44, %v642_v43  ;;  %v664_v61 = vld [vmem:[%s4482_s24 + $0x150] sm:$0xff]  ;;  %v667_v0 = vld [vmem:[%s4482_s24 + $0x168] sm:$0xff]  ;;  %v4651_v1 = vpack.c.bf16 %v651_v57, %v648_v56 }
 0x102   : > { %3097 = vmatprep.subr.bf16.mxu1 %v3096_v59  ;;  %v658_v49 = vld [vmem:[%s4482_s24 + $0x120] sm:$0xff]  ;;  %v665_v51 = vld [vmem:[%s4482_s24 + $0x158] sm:$0xff]  ;;  %v660_v8 = vld [vmem:[%s4482_s24 + $0x130] sm:$0xff] }
 0x103   : > { %3071 = vmatpush1.bf16.msra.mxu0 %v3070_v53  ;;  %v668_v53 = vld [vmem:[%s4482_s24 + $0x170] sm:$0xff]  ;;  %v4643_v58 = vpack.c.bf16 %v661_v50, %v658_v49  ;;  %v654_v2 = vld [vmem:[%s4482_s24 + $0x100] sm:$0xff]  ;;  %v657_v3 = vld [vmem:[%s4482_s24 + $0x118] sm:$0xff] }
 0x104   : > { %3105 = vmatprep.subr.bf16.mxu0 %v4543_v54  ;;  %v4646_v60 = vpack.c.bf16 %v668_v53, %v665_v51  ;;  %v663_v9 = vld [vmem:[%s4482_s24 + $0x148] sm:$0xff]  ;;  %v666_v11 = vld [vmem:[%s4482_s24 + $0x160] sm:$0xff]  ;;  %v669_v12 = vld [vmem:[%s4482_s24 + $0x178] sm:$0xff] }
 0x105   : > { %3099 = vmatpush3.bf16.msra.mxu1 %v3096_v59  ;;  %v711_v59 = vld [vmem:[#allocation13 + $0x38] sm:$0xff]  ;;  %v4673_v10 = vpack.c.bf16 %v663_v9, %v660_v8  ;;  %v4683_v13 = vpack.c.bf16 %v669_v12, %v666_v11 }
 0x106   : > { %777 = vmatmul.mubr.f32.vlgmr.msra.gmra.mrb[0].mxu0 %v4516_v17  ;;  %3101 = vmatprep.subr.bf16.mxu1 %v3100_v4  ;;  %v640_v17 = vld [vmem:[%s4482_s24 + $0x90] sm:$0xff]  ;;  %v670_v19 = vld [vmem:[%s4484_s0] sm:$0x7]  ;;  %v687_v40 = vld [vmem:[%s4486_s10] sm:$0x7] }
 0x107   : > { %3107 = vmatpush1.bf16.msra.mxu0 %v4551_v62  ;;  %782 = vmatprep.mubr.f32.mxu0 %v4115_v52  ;;  %v4592_v26 = vpack.c.bf16 %v643_v18, %v640_v17 }
 0x108   : > { %3109 = vmatprep.subr.bf16.mxu0 %v4554_v63 }
 0x109   : > { %3103 = vmatpush3.bf16.msra.mxu1 %v3100_v4  ;;  %v4660_v4 = vpack.c.bf16 %v667_v0, %v664_v61 }
 0x10a   : > { %783 = vmatmul.mubr.f32.gmra.mrb[2].mxu0 %v705_v5  ;;  %3136 = vmatprep.subr.bf16.mxu1 %v4116_v21 }
 0x10b   : > { %3111 = vmatpush1.bf16.msra.mxu0 %v4563_v6  ;;  %788 = vmatprep.mubr.f32.mxu0 %v4115_v52 }
 0x10c   : > { %3113 = vmatprep.subr.bf16.mxu0 %v4566_v7  ;;  %2749 = vmatmul.mubr.f32.vlgmr.msra.gmra.mrb[0].mxu1 %v705_v5  ;;  %v4664_v5 = vpack.c.bf16 %v657_v3, %v654_v2 }
 0x10d   : > { %3138 = vmatpush3.bf16.msra.mxu1 %v4586_v22  ;;  %2751 = vmatprep.mubr.f32.mxu1 %v706_v14 }
 0x10e   : > { %789 = vmatmul.mubr.f32.gmra.mrb[4].mxu0 %v706_v14  ;;  %3139 = vmatprep.subr.bf16.mxu1 %v4116_v21  ;;  %v672_v14 = vlaneseq }
 0x10f   : > { %3115 = vmatpush1.bf16.msra.mxu0 %v4576_v15  ;;  %794 = vmatprep.mubr.f32.mxu0 %v4115_v52 }
 0x110   : > { %3117 = vmatprep.subr.bf16.mxu0 %v4579_v16  ;;  %2752 = vmatmul.mubr.f32.gmra.mrb[2].mxu1 %v707_v25  ;;  %v673_v17 = vshrl.u32 %v672_v14, 7 }
 0x111   : > { %3141 = vmatpush3.bf16.msra.mxu1 %v4602_v32  ;;  %2754 = vmatprep.mubr.f32.mxu1 %v708_v35 }
 0x112   : > { %795 = vmatmul.mubr.f32.gmra.mrb[6].mxu0 %v707_v25  ;;  %3142 = vmatprep.subr.bf16.mxu1 %v4116_v21  ;;  %v682_v18 = vsub.s32 2, %v673_v17  ;;  %v674_v39 = vsub.s32 0, %v673_v17 }
 0x113   : > { %3119 = vmatpush1.bf16.msra.mxu0 %v4592_v26  ;;  %800 = vmatprep.mubr.f32.mxu0 %v4115_v52 }
 0x114   : > { %3121 = vmatprep.subr.bf16.mxu0 %v4595_v27  ;;  %2755 = vmatmul.mubr.f32.gmra.mrb[4].mxu1 %v709_v45  ;;  %v683_v20 = vrot.slane %v670_v19, %v682_v18  ;;  %v675_v49 = vrot.slane %v670_v19, %v674_v39  ;;  %v692_v50 = vrot.slane %v687_v40, %v674_v39 }
 0x115   : > { %3144 = vmatpush3.bf16.msra.mxu1 %v4619_v42  ;;  %2757 = vmatprep.mubr.f32.mxu1 %v710_v47 }
 0x116   : > { %801 = vmatmul.mubr.f32.gmra.mrb[8].mxu0 %v708_v35  ;;  %3145 = vmatprep.subr.bf16.mxu1 %v4116_v21  ;;  %v4737_v56 = vadd.f32 %v692_v50, %v675_v49 }
 0x117   : > { %3123 = vmatpush1.bf16.msra.mxu0 %v4609_v36  ;;  %806 = vmatprep.mubr.f32.mxu0 %v4115_v52 }
 0x118   : > { %3125 = vmatprep.subr.bf16.mxu0 %v4612_v37  ;;  %2758 = vmatmul.mubr.f32.gmra.mrb[6].mxu1 %v711_v59 }
 0x119   : > { %3147 = vmatpush3.bf16.msra.mxu1 %v4636_v55  ;;  %2792 = vmatprep.mubr.msk.f32.mxu1 %vm4117_vm0, %v4115_v52 }
 0x11a   : > { %807 = vmatmul.mubr.f32.gmra.mrb[10].mxu0 %v709_v45  ;;  %3148 = vmatprep.subr.bf16.mxu1 %v4116_v21  ;;  %v678_v45 = vsub.s32 1, %v673_v17  ;;  %v4743_v17 = vrot.slane %v687_v40, %v682_v18 }
 0x11b   : > { %3127 = vmatpush1.bf16.msra.mxu0 %v4626_v46  ;;  %812 = vmatprep.mubr.f32.mxu0 %v4115_v52 }
 0x11c   : > { %3129 = vmatprep.subr.bf16.mxu0 %v4629_v48  ;;  %v679_v51 = vrot.slane %v670_v19, %v678_v45  ;;  %v696_v53 = vrot.slane %v687_v40, %v678_v45 }
 0x11d   : > { %3150 = vmatpush3.bf16.msra.mxu1 %v4651_v1 }
 0x11e   : > { %813 = vmatmul.mubr.f32.gmra.mrb[12].mxu0 %v710_v47  ;;  %3151 = vmatprep.subr.bf16.mxu1 %v4116_v21 }
 0x11f   : > { %3131 = vmatpush1.bf16.msra.mxu0 %v4643_v58  ;;  %818 = vmatprep.mubr.f32.mxu0 %v4115_v52 }
 0x120   : > { %3133 = vmatprep.subr.bf16.mxu0 %v4646_v60 }
 0x121   : > { %3153 = vmatpush3.bf16.msra.mxu1 %v4664_v5 }
 0x122   : > { %819 = vmatmul.mubr.f32.gmra.mrb[14].mxu0 %v711_v59  ;;  %3154 = vmatprep.subr.bf16.mxu1 %v4116_v21  ;;  %v4739_v59 = vadd.f32 %v696_v53, %v679_v51 }
 0x123   : > { %3135 = vmatpush1.bf16.msra.mxu0 %v4660_v4  ;;  %1022 = vmatprep.mubr.f32.mxu0 %v4115_v52 }
 0x124   : > { %3161 = vmatprep.subr.bf16.mxu0 %v4543_v54 }
 0x125   : > { %3156 = vmatpush3.bf16.msra.mxu1 %v4673_v10 }
 0x126   : > { %1023 = vmatmul.mubr.f32.vlgmr.msra.gmra.mrb[0].mxu0 %v4115_v52  ;;  %3157 = vmatprep.subr.bf16.mxu1 %v4116_v21 }
 0x127   : > { %3163 = vmatpush1.bf16.msra.mxu0 %v4551_v62  ;;  %1191 = vmatprep.mubr.f32.mxu0 %v4115_v52 }
 0x128   : > { %3165 = vmatprep.subr.bf16.mxu0 %v4554_v63 }
 0x129   : > { %3159 = vmatpush3.bf16.msra.mxu1 %v4683_v13 }
 0x12a   : > { %3192 = vmatprep.subr.bf16.mxu1 %v4116_v21 }
 0x12b   : > { %3167 = vmatpush1.bf16.msra.mxu0 %v4563_v6 }
 0x12c   : > { %3169 = vmatprep.subr.bf16.mxu0 %v4566_v7  ;;  %2793 = vmatmul.mubr.f32.vlgmr.msra.gmra.mrb[8].mxu1 %v4115_v52 }
 0x12d   : > { %3194 = vmatpush3.bf16.msra.mxu1 %v4586_v22  ;;  %2827 = vmatprep.mubr.msk.f32.mxu1 %vm4117_vm0, %v4115_v52 }
 0x12e   : > { %3195 = vmatprep.subr.bf16.mxu1 %v4116_v21 }
 0x12f   : > { %3171 = vmatpush1.bf16.msra.mxu0 %v4576_v15 }
 0x130   : > { %3173 = vmatprep.subr.bf16.mxu0 %v4579_v16 }
 0x131   : > { %3197 = vmatpush3.bf16.msra.mxu1 %v4602_v32 }
 0x132   : > { %3198 = vmatprep.subr.bf16.mxu1 %v4116_v21 }
 0x133   : > { %3175 = vmatpush1.bf16.msra.mxu0 %v4592_v26 }
 0x134   : > { %3177 = vmatprep.subr.bf16.mxu0 %v4595_v27 }
 0x135   : > { %3200 = vmatpush3.bf16.msra.mxu1 %v4619_v42 }
 0x136   : > { %3201 = vmatprep.subr.bf16.mxu1 %v4116_v21 }
 0x137   : > { %3179 = vmatpush1.bf16.msra.mxu0 %v4609_v36 }
 0x138   : > { %3181 = vmatprep.subr.bf16.mxu0 %v4612_v37 }
 0x139   : > { %3203 = vmatpush3.bf16.msra.mxu1 %v4636_v55 }
 0x13a   : > { %3204 = vmatprep.subr.bf16.mxu1 %v4116_v21 }
 0x13b   : > { %3183 = vmatpush1.bf16.msra.mxu0 %v4626_v46 }
 0x13c   : > { %3185 = vmatprep.subr.bf16.mxu0 %v4629_v48 }
 0x13d   : > { %3206 = vmatpush3.bf16.msra.mxu1 %v4651_v1 }
 0x13e   : > { %3207 = vmatprep.subr.bf16.mxu1 %v4116_v21 }
 0x13f   : > { %3187 = vmatpush1.bf16.msra.mxu0 %v4643_v58 }
 0x140   : > { %3189 = vmatprep.subr.bf16.mxu0 %v4646_v60 }
 0x141   : > { %3209 = vmatpush3.bf16.msra.mxu1 %v4664_v5 }
 0x142   : > { %3210 = vmatprep.subr.bf16.mxu1 %v4116_v21 }
 0x143   : > { %3191 = vmatpush1.bf16.msra.mxu0 %v4660_v4 }
 0x144   : > { %3217 = vmatprep.subr.bf16.mxu0 %v4543_v54 }
 0x145   : > { %3212 = vmatpush3.bf16.msra.mxu1 %v4673_v10 }
 0x146   : > { %3213 = vmatprep.subr.bf16.mxu1 %v4116_v21 }
 0x149   : > { %3215 = vmatpush3.bf16.msra.mxu1 %v4683_v13 }
 0x14a   : > { %3248 = vmatprep.subr.bf16.mxu1 %v4116_v21 }
 0x1df   : > { %v2750_v23 = vpop.f32.mrb[0].mxu1 }
 0x1e0   : > { %v4722_v24 = vadd.f32 %v2750_v23, %v683_v20  ;;  %v891_v25 = vpop.f32.mrb[1].mxu1 }
 0x1e3   : > { %v2753_v28 = vpop.f32.mrb[2].mxu1 }
 0x1e4   : > { %v4724_v29 = vadd.f32 %v2753_v28, %v683_v20  ;;  %v901_v30 = vpop.f32.mrb[3].mxu1 }
 0x1e5   : > { %v4726_v31 = vadd.f32 %v901_v30, %v683_v20 }
 0x1e7   : > { %v2756_v33 = vpop.f32.mrb[4].mxu1 }
 0x1e8   : > { %v4728_v34 = vadd.f32 %v2756_v33, %v683_v20  ;;  %v911_v35 = vpop.f32.mrb[5].mxu1  ;;  %v892_v33 = vadd.f32 %v891_v25, %v683_v20 }
 0x1e9   : > { %v4730_v38 = vadd.f32 %v911_v35, %v683_v20 }
 0x1eb   : > { %v2759_v41 = vpop.f32.mrb[6].mxu1 }
 0x1ec   : > { %v4733_v43 = vadd.f32 %v2759_v41, %v683_v20  ;;  %v921_v44 = vpop.f32.mrb[7].mxu1 }
 0x1ed   : > { %v4735_v47 = vadd.f32 %v921_v44, %v683_v20 }
 0x1f9   : > { %v1024_v57 = vpop.f32.mrb[0].mxu0 }
 0x1fa   : > { %v3553_v61 = vadd.f32 %v4737_v56, %v1024_v57  ;;  %v1026_v0 = vpop.f32.mrb[1].mxu0 }
 0x1fb   : > { %v3555_v3 = vadd.f32 %v4739_v59, %v1026_v0 }
 0x1fc   : > { %v2534_v2 = vmul.f32 -1.442695, %v3553_v61 }
 0x1fd   : > { %v2535_v8 = vmul.f32 -1.442695, %v3555_v3 }
 0x1fe   : > { %3726 = vpow2.f32 %v2534_v2 }
 0x1ff   : > { %v1095_v9 = vpop.f32.mrb[8].mxu1  ;;  %3728 = vpow2.f32 %v2535_v8 }
 0x200   : > { %v2794_v11 = vpop.f32.mrb[9].mxu1  ;;  %v1096_v28 = vadd.f32 %v1095_v9, %v4743_v17 }
 0x208   : > { %v3727_v12 = vpop.eup %3726 }
 0x209   : > { %v1103_v14 = vadd.f32 1.0, %v3727_v12  ;;  %v3729_v19 = vpop.eup %3728 }
 0x20a   : > { %v1110_v23 = vadd.f32 1.0, %v3729_v19 }
 0x20b   : > { %3730 = vrcp.f32 %v1103_v14 }
 0x20c   : > { %3732 = vrcp.f32 %v1110_v23 }
 0x215   : > { %v3731_v30 = vpop.eup %3730 }
 0x216   : > { %v1113_v35 = vmul.f32 %v3731_v30, %v1096_v28  ;;  %v3733_v41 = vpop.eup %3732 }
 0x217   : > { %v1116_v44 = vsub.f32 1.0, %v3733_v41  ;;  %v1118_v50 = vmul.f32 0.0, %v3733_v41 }
 0x218   : > { %v1114_v39 = vadd.f32 %v1113_v35, %v892_v33 }
 0x21a   : > { %3734 = vtanh.f32 %v1114_v39 }
 0x224   : > { %v3735_v45 = vpop.eup %3734 }
 0x225   : > { %v1117_v49 = vmul.f32 %v3735_v45, %v1116_v44 }
 0x227   : > { %v4746_v51 = vadd.f32 %v1118_v50, %v1117_v49 }
 0x229   : > { %1121 = vst [vmem:[#allocation13] sm:$0xff] %v4746_v51  ;;  %1192 = vmatmul.mubr.f32.vlgmr.msra.gmra.mrb[2].mxu0 %v4746_v51  ;;  %2828 = vmatmul.mubr.f32.vlgmr.msra.gmra.mrb[10].mxu1 %v4746_v51 }
 0x22a   : > { %3219 = vmatpush1.bf16.msra.mxu0 %v4551_v62  ;;  %3250 = vmatpush3.bf16.msra.mxu1 %v4586_v22 }
 0x22b   : > { %3221 = vmatprep.subr.bf16.mxu0 %v4554_v63  ;;  %3251 = vmatprep.subr.bf16.mxu1 %v4116_v21 }
 0x22c   : > { %1361 = vmatprep.mubr.f32.mxu0 %v4115_v52  ;;  %2862 = vmatprep.mubr.msk.f32.mxu1 %vm4117_vm0, %v4115_v52 }
 0x22e   : > { %3223 = vmatpush1.bf16.msra.mxu0 %v4563_v6  ;;  %3253 = vmatpush3.bf16.msra.mxu1 %v4602_v32 }
 0x22f   : > { %3225 = vmatprep.subr.bf16.mxu0 %v4566_v7  ;;  %3254 = vmatprep.subr.bf16.mxu1 %v4116_v21 }
 0x232   : > { %3227 = vmatpush1.bf16.msra.mxu0 %v4576_v15  ;;  %3256 = vmatpush3.bf16.msra.mxu1 %v4619_v42 }
 0x233   : > { %3229 = vmatprep.subr.bf16.mxu0 %v4579_v16  ;;  %3257 = vmatprep.subr.bf16.mxu1 %v4116_v21 }
 0x236   : > { %3231 = vmatpush1.bf16.msra.mxu0 %v4592_v26  ;;  %3259 = vmatpush3.bf16.msra.mxu1 %v4636_v55 }
 0x237   : > { %3233 = vmatprep.subr.bf16.mxu0 %v4595_v27  ;;  %3260 = vmatprep.subr.bf16.mxu1 %v4116_v21 }
 0x23a   : > { %3235 = vmatpush1.bf16.msra.mxu0 %v4609_v36  ;;  %3262 = vmatpush3.bf16.msra.mxu1 %v4651_v1 }
 0x23b   : > { %3237 = vmatprep.subr.bf16.mxu0 %v4612_v37  ;;  %3263 = vmatprep.subr.bf16.mxu1 %v4116_v21 }
 0x23e   : > { %3239 = vmatpush1.bf16.msra.mxu0 %v4626_v46  ;;  %3265 = vmatpush3.bf16.msra.mxu1 %v4664_v5 }
 0x23f   : > { %3241 = vmatprep.subr.bf16.mxu0 %v4629_v48  ;;  %3266 = vmatprep.subr.bf16.mxu1 %v4116_v21 }
 0x242   : > { %3243 = vmatpush1.bf16.msra.mxu0 %v4643_v58  ;;  %3268 = vmatpush3.bf16.msra.mxu1 %v4673_v10 }
 0x243   : > { %3245 = vmatprep.subr.bf16.mxu0 %v4646_v60  ;;  %3269 = vmatprep.subr.bf16.mxu1 %v4116_v21 }
 0x246   : > { %3247 = vmatpush1.bf16.msra.mxu0 %v4660_v4  ;;  %3271 = vmatpush3.bf16.msra.mxu1 %v4683_v13 }
 0x247   : > { %3273 = vmatprep.subr.bf16.mxu0 %v4543_v54  ;;  %3304 = vmatprep.subr.bf16.mxu1 %v4116_v21 }
 0x2fc   : > { %v1193_v18 = vpop.f32.mrb[2].mxu0  ;;  %v1264_v20 = vpop.f32.mrb[10].mxu1 }
 0x2fd   : > { %v3557_v25 = vadd.f32 %v4737_v56, %v1193_v18  ;;  %v1195_v40 = vpop.f32.mrb[3].mxu0  ;;  %v2829_v53 = vpop.f32.mrb[11].mxu1  ;;  %v1265_v11 = vadd.f32 %v1264_v20, %v4743_v17 }
 0x2fe   : > { %v3559_v61 = vadd.f32 %v4739_v59, %v1195_v40 }
 0x2ff   : > { %v2536_v57 = vmul.f32 -1.442695, %v3557_v25 }
 0x300   : > { %v2537_v0 = vmul.f32 -1.442695, %v3559_v61 }
 0x301   : > { %3736 = vpow2.f32 %v2536_v57 }
 0x302   : > { %3738 = vpow2.f32 %v2537_v0 }
 0x30b   : > { %v3737_v2 = vpop.eup %3736 }
 0x30c   : > { %v1272_v3 = vadd.f32 1.0, %v3737_v2  ;;  %v3739_v8 = vpop.eup %3738 }
 0x30d   : > { %v1279_v9 = vadd.f32 1.0, %v3739_v8 }
 0x30e   : > { %3740 = vrcp.f32 %v1272_v3 }
 0x30f   : > { %3742 = vrcp.f32 %v1279_v9 }
 0x318   : > { %v3741_v12 = vpop.eup %3740 }
 0x319   : > { %v1282_v14 = vmul.f32 %v3741_v12, %v1265_v11  ;;  %v3743_v23 = vpop.eup %3742 }
 0x31a   : > { %v1285_v28 = vsub.f32 1.0, %v3743_v23  ;;  %v1287_v35 = vmul.f32 %v3743_v23, %v4746_v51 }
 0x31b   : > { %v1283_v19 = vadd.f32 %v1282_v14, %v4722_v24 }
 0x31d   : > { %3744 = vtanh.f32 %v1283_v19 }
 0x327   : > { %v3745_v30 = vpop.eup %3744 }
 0x328   : > { %v1286_v33 = vmul.f32 %v3745_v30, %v1285_v28 }
 0x32a   : > { %v4791_v39 = vadd.f32 %v1287_v35, %v1286_v33 }
 0x32c   : > { %1291 = vst [vmem:[#allocation13 + $0x8] sm:$0xff] %v4791_v39  ;;  %1362 = vmatmul.mubr.f32.vlgmr.msra.gmra.mrb[4].mxu0 %v4791_v39  ;;  %2863 = vmatmul.mubr.f32.vlgmr.msra.gmra.mrb[12].mxu1 %v4791_v39 }
 0x32d   : > { %3275 = vmatpush1.bf16.msra.mxu0 %v4551_v62  ;;  %3306 = vmatpush3.bf16.msra.mxu1 %v4586_v22 }
 0x32e   : > { %3277 = vmatprep.subr.bf16.mxu0 %v4554_v63  ;;  %3307 = vmatprep.subr.bf16.mxu1 %v4116_v21 }
 0x32f   : > { %1531 = vmatprep.mubr.f32.mxu0 %v4115_v52  ;;  %2897 = vmatprep.mubr.msk.f32.mxu1 %vm4117_vm0, %v4115_v52 }
 0x331   : > { %3279 = vmatpush1.bf16.msra.mxu0 %v4563_v6  ;;  %3309 = vmatpush3.bf16.msra.mxu1 %v4602_v32 }
 0x332   : > { %3281 = vmatprep.subr.bf16.mxu0 %v4566_v7  ;;  %3310 = vmatprep.subr.bf16.mxu1 %v4116_v21 }
 0x335   : > { %3283 = vmatpush1.bf16.msra.mxu0 %v4576_v15  ;;  %3312 = vmatpush3.bf16.msra.mxu1 %v4619_v42 }
 0x336   : > { %3285 = vmatprep.subr.bf16.mxu0 %v4579_v16  ;;  %3313 = vmatprep.subr.bf16.mxu1 %v4116_v21 }
 0x339   : > { %3287 = vmatpush1.bf16.msra.mxu0 %v4592_v26  ;;  %3315 = vmatpush3.bf16.msra.mxu1 %v4636_v55 }
 0x33a   : > { %3289 = vmatprep.subr.bf16.mxu0 %v4595_v27  ;;  %3316 = vmatprep.subr.bf16.mxu1 %v4116_v21 }
 0x33d   : > { %3291 = vmatpush1.bf16.msra.mxu0 %v4609_v36  ;;  %3318 = vmatpush3.bf16.msra.mxu1 %v4651_v1 }
 0x33e   : > { %3293 = vmatprep.subr.bf16.mxu0 %v4612_v37  ;;  %3319 = vmatprep.subr.bf16.mxu1 %v4116_v21 }
 0x341   : > { %3295 = vmatpush1.bf16.msra.mxu0 %v4626_v46  ;;  %3321 = vmatpush3.bf16.msra.mxu1 %v4664_v5 }
 0x342   : > { %3297 = vmatprep.subr.bf16.mxu0 %v4629_v48  ;;  %3322 = vmatprep.subr.bf16.mxu1 %v4116_v21 }
 0x345   : > { %3299 = vmatpush1.bf16.msra.mxu0 %v4643_v58  ;;  %3324 = vmatpush3.bf16.msra.mxu1 %v4673_v10 }
 0x346   : > { %3301 = vmatprep.subr.bf16.mxu0 %v4646_v60  ;;  %3325 = vmatprep.subr.bf16.mxu1 %v4116_v21 }
 0x349   : > { %3303 = vmatpush1.bf16.msra.mxu0 %v4660_v4  ;;  %3327 = vmatpush3.bf16.msra.mxu1 %v4683_v13 }
 0x34a   : > { %3329 = vmatprep.subr.bf16.mxu0 %v4543_v54  ;;  %3360 = vmatprep.subr.bf16.mxu1 %v4116_v21 }
 0x3ff   : > { %v1363_v24 = vpop.f32.mrb[4].mxu0  ;;  %v1434_v41 = vpop.f32.mrb[12].mxu1 }
 0x400   : > { %v3561_v44 = vadd.f32 %v4737_v56, %v1363_v24  ;;  %v1365_v45 = vpop.f32.mrb[5].mxu0  ;;  %v2864_v49 = vpop.f32.mrb[13].mxu1  ;;  %v1435_v57 = vadd.f32 %v1434_v41, %v4743_v17 }
 0x401   : > { %v3563_v51 = vadd.f32 %v4739_v59, %v1365_v45 }
 0x402   : > { %v2538_v50 = vmul.f32 -1.442695, %v3561_v44 }
 0x403   : > { %v2539_v18 = vmul.f32 -1.442695, %v3563_v51 }
 0x404   : > { %3746 = vpow2.f32 %v2538_v50 }
 0x405   : > { %3748 = vpow2.f32 %v2539_v18 }
 0x40e   : > { %v3747_v20 = vpop.eup %3746 }
 0x40f   : > { %v1442_v25 = vadd.f32 1.0, %v3747_v20  ;;  %v3749_v40 = vpop.eup %3748 }
 0x410   : > { %v1449_v53 = vadd.f32 1.0, %v3749_v40 }
 0x411   : > { %3750 = vrcp.f32 %v1442_v25 }
 0x412   : > { %3752 = vrcp.f32 %v1449_v53 }
 0x41b   : > { %v3751_v61 = vpop.eup %3750 }
 0x41c   : > { %v1452_v0 = vmul.f32 %v3751_v61, %v1435_v57  ;;  %v3753_v3 = vpop.eup %3752 }
 0x41d   : > { %v1455_v8 = vsub.f32 1.0, %v3753_v3  ;;  %v1457_v12 = vmul.f32 %v3753_v3, %v4791_v39 }
 0x41e   : > { %v1453_v2 = vadd.f32 %v1452_v0, %v4726_v31 }
 0x420   : > { %3754 = vtanh.f32 %v1453_v2 }
 0x42a   : > { %v3755_v9 = vpop.eup %3754 }
 0x42b   : > { %v1456_v11 = vmul.f32 %v3755_v9, %v1455_v8 }
 0x42d   : > { %v4836_v14 = vadd.f32 %v1457_v12, %v1456_v11 }
 0x42f   : > { %1461 = vst [vmem:[#allocation13 + $0x10] sm:$0xff] %v4836_v14  ;;  %1532 = vmatmul.mubr.f32.vlgmr.msra.gmra.mrb[6].mxu0 %v4836_v14  ;;  %2898 = vmatmul.mubr.f32.vlgmr.msra.gmra.mrb[14].mxu1 %v4836_v14 }
 0x430   : > { %3331 = vmatpush1.bf16.msra.mxu0 %v4551_v62  ;;  %3362 = vmatpush3.bf16.msra.mxu1 %v4586_v22 }
 0x431   : > { %3333 = vmatprep.subr.bf16.mxu0 %v4554_v63  ;;  %3363 = vmatprep.subr.bf16.mxu1 %v4116_v21 }
 0x432   : > { %1701 = vmatprep.mubr.f32.mxu0 %v4115_v52  ;;  %2932 = vmatprep.mubr.msk.f32.mxu1 %vm4117_vm0, %v4115_v52 }
 0x434   : > { %3335 = vmatpush1.bf16.msra.mxu0 %v4563_v6  ;;  %3365 = vmatpush3.bf16.msra.mxu1 %v4602_v32 }
 0x435   : > { %3337 = vmatprep.subr.bf16.mxu0 %v4566_v7  ;;  %3366 = vmatprep.subr.bf16.mxu1 %v4116_v21 }
 0x438   : > { %3339 = vmatpush1.bf16.msra.mxu0 %v4576_v15  ;;  %3368 = vmatpush3.bf16.msra.mxu1 %v4619_v42 }
 0x439   : > { %3341 = vmatprep.subr.bf16.mxu0 %v4579_v16  ;;  %3369 = vmatprep.subr.bf16.mxu1 %v4116_v21 }
 0x43c   : > { %3343 = vmatpush1.bf16.msra.mxu0 %v4592_v26  ;;  %3371 = vmatpush3.bf16.msra.mxu1 %v4636_v55 }
 0x43d   : > { %3345 = vmatprep.subr.bf16.mxu0 %v4595_v27  ;;  %3372 = vmatprep.subr.bf16.mxu1 %v4116_v21 }
 0x440   : > { %3347 = vmatpush1.bf16.msra.mxu0 %v4609_v36  ;;  %3374 = vmatpush3.bf16.msra.mxu1 %v4651_v1 }
 0x441   : > { %3349 = vmatprep.subr.bf16.mxu0 %v4612_v37  ;;  %3375 = vmatprep.subr.bf16.mxu1 %v4116_v21 }
 0x444   : > { %3351 = vmatpush1.bf16.msra.mxu0 %v4626_v46  ;;  %3377 = vmatpush3.bf16.msra.mxu1 %v4664_v5 }
 0x445   : > { %3353 = vmatprep.subr.bf16.mxu0 %v4629_v48  ;;  %3378 = vmatprep.subr.bf16.mxu1 %v4116_v21 }
 0x448   : > { %3355 = vmatpush1.bf16.msra.mxu0 %v4643_v58  ;;  %3380 = vmatpush3.bf16.msra.mxu1 %v4673_v10 }
 0x449   : > { %3357 = vmatprep.subr.bf16.mxu0 %v4646_v60  ;;  %3381 = vmatprep.subr.bf16.mxu1 %v4116_v21 }
 0x44c   : > { %3359 = vmatpush1.bf16.msra.mxu0 %v4660_v4  ;;  %3383 = vmatpush3.bf16.msra.mxu1 %v4683_v13 }
 0x44d   : > { %3385 = vmatprep.subr.bf16.mxu0 %v4543_v54  ;;  %3416 = vmatprep.subr.bf16.mxu1 %v4116_v21 }
 0x502   : > { %v1533_v31 = vpop.f32.mrb[6].mxu0  ;;  %v1604_v19 = vpop.f32.mrb[14].mxu1 }
 0x503   : > { %v3565_v23 = vadd.f32 %v4737_v56, %v1533_v31  ;;  %v1535_v28 = vpop.f32.mrb[7].mxu0  ;;  %v2899_v30 = vpop.f32.mrb[15].mxu1  ;;  %v1605_v49 = vadd.f32 %v1604_v19, %v4743_v17 }
 0x504   : > { %v3567_v35 = vadd.f32 %v4739_v59, %v1535_v28 }
 0x505   : > { %v2540_v33 = vmul.f32 -1.442695, %v3565_v23 }
 0x506   : > { %v2541_v39 = vmul.f32 -1.442695, %v3567_v35 }
 0x507   : > { %3756 = vpow2.f32 %v2540_v33 }
 0x508   : > { %3758 = vpow2.f32 %v2541_v39 }
 0x511   : > { %v3757_v24 = vpop.eup %3756 }
 0x512   : > { %v1612_v41 = vadd.f32 1.0, %v3757_v24  ;;  %v3759_v44 = vpop.eup %3758 }
 0x513   : > { %v1619_v45 = vadd.f32 1.0, %v3759_v44 }
 0x514   : > { %3760 = vrcp.f32 %v1612_v41 }
 0x515   : > { %3762 = vrcp.f32 %v1619_v45 }
 0x51e   : > { %v3761_v50 = vpop.eup %3760 }
 0x51f   : > { %v1622_v51 = vmul.f32 %v3761_v50, %v1605_v49  ;;  %v3763_v20 = vpop.eup %3762 }
 0x520   : > { %v1625_v25 = vsub.f32 1.0, %v3763_v20  ;;  %v1627_v57 = vmul.f32 %v3763_v20, %v4836_v14 }
 0x521   : > { %v1623_v18 = vadd.f32 %v1622_v51, %v4724_v29 }
 0x523   : > { %3764 = vtanh.f32 %v1623_v18 }
 0x52d   : > { %v3765_v40 = vpop.eup %3764 }
 0x52e   : > { %v1626_v53 = vmul.f32 %v3765_v40, %v1625_v25 }
 0x530   : > { %v4881_v61 = vadd.f32 %v1627_v57, %v1626_v53 }
 0x532   : > { %1631 = vst [vmem:[#allocation13 + $0x18] sm:$0xff] %v4881_v61  ;;  %1702 = vmatmul.mubr.f32.vlgmr.msra.gmra.mrb[8].mxu0 %v4881_v61  ;;  %2933 = vmatmul.mubr.f32.vlgmr.msra.gmra.mrb[16].mxu1 %v4881_v61 }
 0x533   : > { %3387 = vmatpush1.bf16.msra.mxu0 %v4551_v62  ;;  %3418 = vmatpush3.bf16.msra.mxu1 %v4586_v22 }
 0x534   : > { %3389 = vmatprep.subr.bf16.mxu0 %v4554_v63  ;;  %3419 = vmatprep.subr.bf16.mxu1 %v4116_v21 }
 0x535   : > { %1871 = vmatprep.mubr.f32.mxu0 %v4115_v52  ;;  %2967 = vmatprep.mubr.msk.f32.mxu1 %vm4117_vm0, %v4115_v52 }
 0x537   : > { %3391 = vmatpush1.bf16.msra.mxu0 %v4563_v6  ;;  %3421 = vmatpush3.bf16.msra.mxu1 %v4602_v32 }
 0x538   : > { %3393 = vmatprep.subr.bf16.mxu0 %v4566_v7  ;;  %3422 = vmatprep.subr.bf16.mxu1 %v4116_v21 }
 0x53b   : > { %3395 = vmatpush1.bf16.msra.mxu0 %v4576_v15  ;;  %3424 = vmatpush3.bf16.msra.mxu1 %v4619_v42 }
 0x53c   : > { %3397 = vmatprep.subr.bf16.mxu0 %v4579_v16  ;;  %3425 = vmatprep.subr.bf16.mxu1 %v4116_v21 }
 0x53f   : > { %3399 = vmatpush1.bf16.msra.mxu0 %v4592_v26  ;;  %3427 = vmatpush3.bf16.msra.mxu1 %v4636_v55 }
 0x540   : > { %3401 = vmatprep.subr.bf16.mxu0 %v4595_v27  ;;  %3428 = vmatprep.subr.bf16.mxu1 %v4116_v21 }
 0x543   : > { %3403 = vmatpush1.bf16.msra.mxu0 %v4609_v36  ;;  %3430 = vmatpush3.bf16.msra.mxu1 %v4651_v1 }
 0x544   : > { %3405 = vmatprep.subr.bf16.mxu0 %v4612_v37  ;;  %3431 = vmatprep.subr.bf16.mxu1 %v4116_v21 }
 0x547   : > { %3407 = vmatpush1.bf16.msra.mxu0 %v4626_v46  ;;  %3433 = vmatpush3.bf16.msra.mxu1 %v4664_v5 }
 0x548   : > { %3409 = vmatprep.subr.bf16.mxu0 %v4629_v48  ;;  %3434 = vmatprep.subr.bf16.mxu1 %v4116_v21 }
 0x54b   : > { %3411 = vmatpush1.bf16.msra.mxu0 %v4643_v58  ;;  %3436 = vmatpush3.bf16.msra.mxu1 %v4673_v10 }
 0x54c   : > { %3413 = vmatprep.subr.bf16.mxu0 %v4646_v60  ;;  %3437 = vmatprep.subr.bf16.mxu1 %v4116_v21 }
 0x54f   : > { %3415 = vmatpush1.bf16.msra.mxu0 %v4660_v4  ;;  %3439 = vmatpush3.bf16.msra.mxu1 %v4683_v13 }
 0x550   : > { %3441 = vmatprep.subr.bf16.mxu0 %v4543_v54  ;;  %3472 = vmatprep.subr.bf16.mxu1 %v4116_v21 }
 0x605   : > { %v1703_v29 = vpop.f32.mrb[8].mxu0  ;;  %v1774_v0 = vpop.f32.mrb[16].mxu1 }
 0x606   : > { %v3569_v2 = vadd.f32 %v4737_v56, %v1703_v29  ;;  %v1705_v3 = vpop.f32.mrb[9].mxu0  ;;  %v2934_v8 = vpop.f32.mrb[17].mxu1  ;;  %v1775_v28 = vadd.f32 %v1774_v0, %v4743_v17 }
 0x607   : > { %v3571_v11 = vadd.f32 %v4739_v59, %v1705_v3 }
 0x608   : > { %v2542_v9 = vmul.f32 -1.442695, %v3569_v2 }
 0x609   : > { %v2543_v12 = vmul.f32 -1.442695, %v3571_v11 }
 0x60a   : > { %3766 = vpow2.f32 %v2542_v9 }
 0x60b   : > { %3768 = vpow2.f32 %v2543_v12 }
 0x614   : > { %v3767_v14 = vpop.eup %3766 }
 0x615   : > { %v1782_v31 = vadd.f32 1.0, %v3767_v14  ;;  %v3769_v19 = vpop.eup %3768 }
 0x616   : > { %v1789_v23 = vadd.f32 1.0, %v3769_v19 }
 0x617   : > { %3770 = vrcp.f32 %v1782_v31 }
 0x618   : > { %3772 = vrcp.f32 %v1789_v23 }
 0x621   : > { %v3771_v30 = vpop.eup %3770 }
 0x622   : > { %v1792_v33 = vmul.f32 %v3771_v30, %v1775_v28  ;;  %v3773_v39 = vpop.eup %3772 }
 0x623   : > { %v1795_v24 = vsub.f32 1.0, %v3773_v39  ;;  %v1797_v45 = vmul.f32 %v3773_v39, %v4881_v61 }
 0x624   : > { %v1793_v35 = vadd.f32 %v1792_v33, %v4730_v38 }
 0x626   : > { %3774 = vtanh.f32 %v1793_v35 }
 0x630   : > { %v3775_v41 = vpop.eup %3774 }
 0x631   : > { %v1796_v44 = vmul.f32 %v3775_v41, %v1795_v24 }
 0x633   : > { %v4926_v49 = vadd.f32 %v1797_v45, %v1796_v44 }
 0x635   : > { %1801 = vst [vmem:[#allocation13 + $0x20] sm:$0xff] %v4926_v49  ;;  %1872 = vmatmul.mubr.f32.vlgmr.msra.gmra.mrb[10].mxu0 %v4926_v49  ;;  %2968 = vmatmul.mubr.f32.vlgmr.msra.gmra.mrb[18].mxu1 %v4926_v49 }
 0x636   : > { %3443 = vmatpush1.bf16.msra.mxu0 %v4551_v62  ;;  %3474 = vmatpush3.bf16.msra.mxu1 %v4586_v22 }
 0x637   : > { %3445 = vmatprep.subr.bf16.mxu0 %v4554_v63  ;;  %3475 = vmatprep.subr.bf16.mxu1 %v4116_v21 }
 0x638   : > { %2041 = vmatprep.mubr.f32.mxu0 %v4115_v52  ;;  %3002 = vmatprep.mubr.msk.f32.mxu1 %vm4117_vm0, %v4115_v52 }
 0x63a   : > { %3447 = vmatpush1.bf16.msra.mxu0 %v4563_v6  ;;  %3477 = vmatpush3.bf16.msra.mxu1 %v4602_v32 }
 0x63b   : > { %3449 = vmatprep.subr.bf16.mxu0 %v4566_v7  ;;  %3478 = vmatprep.subr.bf16.mxu1 %v4116_v21 }
 0x63e   : > { %3451 = vmatpush1.bf16.msra.mxu0 %v4576_v15  ;;  %3480 = vmatpush3.bf16.msra.mxu1 %v4619_v42 }
 0x63f   : > { %3453 = vmatprep.subr.bf16.mxu0 %v4579_v16  ;;  %3481 = vmatprep.subr.bf16.mxu1 %v4116_v21 }
 0x642   : > { %3455 = vmatpush1.bf16.msra.mxu0 %v4592_v26  ;;  %3483 = vmatpush3.bf16.msra.mxu1 %v4636_v55 }
 0x643   : > { %3457 = vmatprep.subr.bf16.mxu0 %v4595_v27  ;;  %3484 = vmatprep.subr.bf16.mxu1 %v4116_v21 }
 0x646   : > { %3459 = vmatpush1.bf16.msra.mxu0 %v4609_v36  ;;  %3486 = vmatpush3.bf16.msra.mxu1 %v4651_v1 }
 0x647   : > { %3461 = vmatprep.subr.bf16.mxu0 %v4612_v37  ;;  %3487 = vmatprep.subr.bf16.mxu1 %v4116_v21 }
 0x64a   : > { %3463 = vmatpush1.bf16.msra.mxu0 %v4626_v46  ;;  %3489 = vmatpush3.bf16.msra.mxu1 %v4664_v5 }
 0x64b   : > { %3465 = vmatprep.subr.bf16.mxu0 %v4629_v48  ;;  %3490 = vmatprep.subr.bf16.mxu1 %v4116_v21 }
 0x64e   : > { %3467 = vmatpush1.bf16.msra.mxu0 %v4643_v58  ;;  %3492 = vmatpush3.bf16.msra.mxu1 %v4673_v10 }
 0x64f   : > { %3469 = vmatprep.subr.bf16.mxu0 %v4646_v60  ;;  %3493 = vmatprep.subr.bf16.mxu1 %v4116_v21 }
 0x652   : > { %3471 = vmatpush1.bf16.msra.mxu0 %v4660_v4  ;;  %3495 = vmatpush3.bf16.msra.mxu1 %v4683_v13 }
 0x653   : > { %3497 = vmatprep.subr.bf16.mxu0 %v4543_v54  ;;  %3528 = vmatprep.subr.bf16.mxu1 %v4116_v21 }
 0x708   : > { %v1873_v38 = vpop.f32.mrb[10].mxu0  ;;  %v1944_v50 = vpop.f32.mrb[18].mxu1 }
 0x709   : > { %v3573_v51 = vadd.f32 %v4737_v56, %v1873_v38  ;;  %v1875_v18 = vpop.f32.mrb[11].mxu0  ;;  %v2969_v20 = vpop.f32.mrb[19].mxu1  ;;  %v1945_v54 = vadd.f32 %v1944_v50, %v4743_v17 }
 0x70a   : > { %v3575_v40 = vadd.f32 %v4739_v59, %v1875_v18 }
 0x70b   : > { %v2544_v25 = vmul.f32 -1.442695, %v3573_v51 }
 0x70c   : > { %v2545_v53 = vmul.f32 -1.442695, %v3575_v40 }
 0x70d   : > { %3776 = vpow2.f32 %v2544_v25 }
 0x70e   : > { %3778 = vpow2.f32 %v2545_v53 }
 0x717   : > { %v3777_v57 = vpop.eup %3776 }
 0x718   : > { %v1952_v61 = vadd.f32 1.0, %v3777_v57  ;;  %v3779_v29 = vpop.eup %3778 }
 0x719   : > { %v1959_v0 = vadd.f32 1.0, %v3779_v29 }
 0x71a   : > { %3780 = vrcp.f32 %v1952_v61 }
 0x71b   : > { %3782 = vrcp.f32 %v1959_v0 }
 0x724   : > { %v3781_v2 = vpop.eup %3780 }
 0x725   : > { %v1962_v3 = vmul.f32 %v3781_v2, %v1945_v54  ;;  %v3783_v9 = vpop.eup %3782 }
 0x726   : > { %v1965_v11 = vsub.f32 1.0, %v3783_v9  ;;  %v1967_v31 = vmul.f32 %v3783_v9, %v4926_v49 }
 0x727   : > { %v1963_v8 = vadd.f32 %v1962_v3, %v4728_v34 }
 0x729   : > { %3784 = vtanh.f32 %v1963_v8 }
 0x733   : > { %v3785_v12 = vpop.eup %3784 }
 0x734   : > { %v1966_v14 = vmul.f32 %v3785_v12, %v1965_v11 }
 0x736   : > { %v1968_v19 = vadd.f32 %v1967_v31, %v1966_v14 }
 0x738   : > { %1971 = vst [vmem:[#allocation13 + $0x28] sm:$0xff] %v1968_v19  ;;  %2042 = vmatmul.mubr.f32.vlgmr.msra.gmra.mrb[12].mxu0 %v1968_v19  ;;  %3003 = vmatmul.mubr.f32.vlgmr.msra.gmra.mrb[20].mxu1 %v1968_v19 }
 0x739   : > { %3499 = vmatpush1.bf16.msra.mxu0 %v4551_v62  ;;  %3530 = vmatpush3.bf16.msra.mxu1 %v4586_v22 }
 0x73a   : > { %3501 = vmatprep.subr.bf16.mxu0 %v4554_v63  ;;  %3531 = vmatprep.subr.bf16.mxu1 %v4116_v21 }
 0x73b   : > { %2211 = vmatprep.mubr.f32.mxu0 %v4115_v52  ;;  %3037 = vmatprep.mubr.msk.f32.mxu1 %vm4117_vm0, %v4115_v52 }
 0x73d   : > { %3503 = vmatpush1.bf16.msra.mxu0 %v4563_v6  ;;  %3533 = vmatpush3.bf16.msra.mxu1 %v4602_v32 }
 0x73e   : > { %3505 = vmatprep.subr.bf16.mxu0 %v4566_v7  ;;  %3534 = vmatprep.subr.bf16.mxu1 %v4116_v21 }
 0x741   : > { %3507 = vmatpush1.bf16.msra.mxu0 %v4576_v15  ;;  %3536 = vmatpush3.bf16.msra.mxu1 %v4619_v42 }
 0x742   : > { %3509 = vmatprep.subr.bf16.mxu0 %v4579_v16  ;;  %3537 = vmatprep.subr.bf16.mxu1 %v4116_v21 }
 0x745   : > { %3511 = vmatpush1.bf16.msra.mxu0 %v4592_v26  ;;  %3539 = vmatpush3.bf16.msra.mxu1 %v4636_v55 }
 0x746   : > { %3513 = vmatprep.subr.bf16.mxu0 %v4595_v27  ;;  %3540 = vmatprep.subr.bf16.mxu1 %v4116_v21 }
 0x749   : > { %3515 = vmatpush1.bf16.msra.mxu0 %v4609_v36  ;;  %3542 = vmatpush3.bf16.msra.mxu1 %v4651_v1 }
 0x74a   : > { %3517 = vmatprep.subr.bf16.mxu0 %v4612_v37  ;;  %3543 = vmatprep.subr.bf16.mxu1 %v4116_v21 }
 0x74d   : > { %3519 = vmatpush1.bf16.msra.mxu0 %v4626_v46  ;;  %3545 = vmatpush3.bf16.msra.mxu1 %v4664_v5 }
 0x74e   : > { %3521 = vmatprep.subr.bf16.mxu0 %v4629_v48  ;;  %3546 = vmatprep.subr.bf16.mxu1 %v4116_v21 }
 0x751   : > { %3523 = vmatpush1.bf16.msra.mxu0 %v4643_v58  ;;  %3548 = vmatpush3.bf16.msra.mxu1 %v4673_v10 }
 0x752   : > { %3525 = vmatprep.subr.bf16.mxu0 %v4646_v60  ;;  %3549 = vmatprep.subr.bf16.mxu1 %v4116_v21 }
 0x755   : > { %3527 = vmatpush1.bf16.msra.mxu0 %v4660_v4  ;;  %3551 = vmatpush3.bf16.msra.mxu1 %v4683_v13 }
 0x80b   : > { %v2043_v52 = vpop.f32.mrb[12].mxu0  ;;  %v2114_v62 = vpop.f32.mrb[20].mxu1 }
 0x80c   : > { %v3577_v63 = vadd.f32 %v4737_v56, %v2043_v52  ;;  %v2045_v6 = vpop.f32.mrb[13].mxu0  ;;  %v3004_v7 = vpop.f32.mrb[21].mxu1  ;;  %v2115_v36 = vadd.f32 %v2114_v62, %v4743_v17 }
 0x80d   : > { %v3579_v16 = vadd.f32 %v4739_v59, %v2045_v6 }
 0x80e   : > { %v2546_v15 = vmul.f32 -1.442695, %v3577_v63 }
 0x80f   : > { %v2547_v22 = vmul.f32 -1.442695, %v3579_v16 }
 0x810   : > { %3786 = vpow2.f32 %v2546_v15 }
 0x811   : > { %3788 = vpow2.f32 %v2547_v22 }
 0x81a   : > { %v3787_v26 = vpop.eup %3786 }
 0x81b   : > { %v2122_v27 = vadd.f32 1.0, %v3787_v26  ;;  %v3789_v21 = vpop.eup %3788 }
 0x81c   : > { %v2129_v32 = vadd.f32 1.0, %v3789_v21 }
 0x81d   : > { %3790 = vrcp.f32 %v2122_v27 }
 0x81e   : > { %3792 = vrcp.f32 %v2129_v32 }
 0x827   : > { %v3791_v37 = vpop.eup %3790 }
 0x828   : > { %v2132_v42 = vmul.f32 %v3791_v37, %v2115_v36  ;;  %v3793_v48 = vpop.eup %3792 }
 0x829   : > { %v2135_v55 = vsub.f32 1.0, %v3793_v48  ;;  %v2137_v1 = vmul.f32 %v3793_v48, %v1968_v19 }
 0x82a   : > { %v2133_v46 = vadd.f32 %v2132_v42, %v4735_v47 }
 0x82c   : > { %3794 = vtanh.f32 %v2133_v46 }
 0x836   : > { %v3795_v58 = vpop.eup %3794 }
 0x837   : > { %v2136_v60 = vmul.f32 %v3795_v58, %v2135_v55 }
 0x839   : > { %v2138_v4 = vadd.f32 %v2137_v1, %v2136_v60 }
 0x83b   : > { %2141 = vst [vmem:[#allocation13 + $0x30] sm:$0xff] %v2138_v4  ;;  %2212 = vmatmul.mubr.f32.vlgmr.msra.gmra.mrb[14].mxu0 %v2138_v4  ;;  %3038 = vmatmul.mubr.f32.vlgmr.msra.gmra.mrb[22].mxu1 %v2138_v4 }
 0x90e   : > { %v2213_v5 = vpop.f32.mrb[14].mxu0  ;;  %v2284_v10 = vpop.f32.mrb[22].mxu1 }
 0x90f   : > { %v3581_v13 = vadd.f32 %v4737_v56, %v2213_v5  ;;  %v2215_v34 = vpop.f32.mrb[15].mxu0  ;;  %v3039_v23 = vpop.f32.mrb[23].mxu1  ;;  %v2285_v41 = vadd.f32 %v2284_v10, %v4743_v17 }
 0x910   : > { %v3583_v30 = vadd.f32 %v4739_v59, %v2215_v34 }
 0x911   : > { %v2548_v28 = vmul.f32 -1.442695, %v3581_v13 }
 0x912   : > { %v2549_v47 = vmul.f32 -1.442695, %v3583_v30 }
 0x913   : > { %3796 = vpow2.f32 %v2548_v28 }
 0x914   : > { %3798 = vpow2.f32 %v2549_v47 }
 0x91d   : > { %v3797_v33 = vpop.eup %3796 }
 0x91e   : > { %v2292_v35 = vadd.f32 1.0, %v3797_v33  ;;  %v3799_v39 = vpop.eup %3798 }
 0x91f   : > { %v2299_v24 = vadd.f32 1.0, %v3799_v39 }
 0x920   : > { %3800 = vrcp.f32 %v2292_v35 }
 0x921   : > { %3802 = vrcp.f32 %v2299_v24 }
 0x92a   : > { %v3801_v44 = vpop.eup %3800 }
 0x92b   : > { %v2302_v45 = vmul.f32 %v3801_v44, %v2285_v41  ;;  %v3803_v59 = vpop.eup %3802 }
 0x92c   : > { %v2305_v49 = vsub.f32 1.0, %v3803_v59  ;;  %v2307_v51 = vmul.f32 %v3803_v59, %v2138_v4 }
 0x92d   : > { %v2303_v56 = vadd.f32 %v2302_v45, %v4733_v43 }
 0x92f   : > { %3804 = vtanh.f32 %v2303_v56 }
 0x939   : > { %v3805_v38 = vpop.eup %3804 }
 0x93a   : > { %v2306_v50 = vmul.f32 %v3805_v38, %v2305_v49 }
 0x93c   : > { %v2308_v18 = vadd.f32 %v2307_v51, %v2306_v50 }
 0x93e   : > { %2311 = vst [vmem:[#allocation13 + $0x38] sm:$0xff] %v2308_v18  ;;  %2313 = vst [vmem:[%s4488_s17] sm:$0xff] %v2308_v18 }
 0x93f   : > { %3995 = shalt.err (!%p3992_p0)
}
 0x940   : > { %s5153_s23 = sld [smem:[#allocation29_spill]]  ;;  %p5154_p13 = pmov %p5152_p4 }
 0x946   : > { %s3996_s18 = scalar_lea.hbm %s5153_s23, 1024 }
 0x947   : > { %p3997_p7 = scmp.ne.s32.totalorder %s5153_s23, %s3996_s18  ;;  %p4002_p9 = scmp.lt.u32.totalorder %s3996_s18, %s5153_s23 }
 0x949   : > { %p3998_p10 = pnand %p3997_p7, %p5154_p13 }
 0x94b   : > { %p3999_p1 = pneg %p3998_p10 }
 0x94d   : > { %p4004_p11 = pnand %p4002_p9, %p3999_p1 }
 0x94f   : > { %4007 = shalt.err (!%p4004_p11)
}
 0x950   : > { %s4119_s2 = smov 128   ;;  %s5155_s24 = sld [smem:[#allocation23_spill]] }
 0x951   : > { %s4120_s0 = smov 8   ;;  %p5156_p3 = pmov %p5152_p4 }
 0x952   : > { %s2315_s11 = scalar_lea.sflag [#allocation15], %s4471_s8  ;;  %s4008_s13 = scalar_lea.vmem %s5019_s16, 128 }
 0x953   : > { %3627 = dma.vmem_to_hbm [thread:$0]  (%p5156_p3), %s2328_s21, 1024, %s5153_s23, [#allocation6], %s4119_s2, %s4119_s2, %s4120_s0  }
 0x954   : > { %p4009_p4 = scmp.ne.s32.totalorder %s5019_s16, %s4008_s13  ;;  %s4121_s9 = smov [#allocation14]  }
 0x955   : > { %s4012_s29 = sshll.u32 %s4121_s9, 4  ;;  %s4013_s29 = int_to_ptr.vmem [resolvable:$false] %s4012_s29 }
 0x956   : > { %p5157_p5 = scmp.ne.s32.totalorder %s5155_s24, 0  ;;  %s4014_s19 = scalar_lea.vmem %s4013_s29, 256 }
 0x957   : > { %p4015_p2 = scmp.lt.s32.totalorder %s5019_s16, %s4013_s29  ;;  %p4016_p8 = scmp.lt.s32.totalorder %s4014_s19, %s4008_s13 }
 0x958   : > { %p4010_p6 = pnand %p4009_p4, %p5157_p5 }
 0x959   : > { %p4017_p0 = por %p4016_p8, %p4015_p2 }
 0x95a   : > { %p4011_p12 = pneg %p4010_p6 }
 0x95c   : > { %p4018_p7 = pnand %p4017_p0, %p4011_p12 }
 0x95e   : > { %4021 = shalt.err (!%p4018_p7)
}
 0x95f   : > { %s4022_s8 = scalar_lea.hbm %s5017_s6, 128  ;;  %s4026_s20 = scalar_lea.hbm %s5096_s7, 256 }
 0x960   : > { %p4023_p13 = scmp.ne.s32.totalorder %s5017_s6, %s4022_s8  ;;  %p4027_p9 = scmp.lt.u32.totalorder %s5017_s6, %s5096_s7 }
 0x961   : > { %p4028_p11 = scmp.lt.u32.totalorder %s4026_s20, %s4022_s8  ;;  %p4030_p4 = scmp.lt.u32.totalorder %s4022_s8, %s5017_s6 }
 0x962   : > { %p4024_p10 = pnand %p4023_p13, %p5157_p5 }
 0x963   : > { %p4029_p3 = por %p4028_p11, %p4027_p9 }
 0x964   : > { %p4025_p1 = pneg %p4024_p10 }
 0x965   : > { %p4031_p6 = por %p4030_p4, %p4029_p3 }
 0x967   : > { %p4032_p12 = pnand %p4031_p6, %p4025_p1 }
 0x969   : > { %4035 = shalt.err (!%p4032_p12)
}
 0x96a   : > { %3628 = dma.vmem_to_hbm [thread:$0]  (%p5157_p5), %s5019_s16, 128, %s5017_s6, %s2315_s11  }
 0x96b   : > { %p5158_p2 = scmp.eq.s32.totalorder %s4193_s30, 1 }
 0x96d   : > { %4073 = dma.done.wait (%p5158_p2), [#allocation6], 1024   ;;  %p5159_p8 = pmov %p5158_p2 }
 0x96f   : > { %4075 = vsyncadd (%p5159_p8), [#allocation6], 4294966272 }
 0x970 PF: > { %s5160_s12 = sld [smem:[#allocation21_spill]]  ;;  %s5161_s22 = sld [smem:[#allocation24_spill]] }
 0x971   : > { %s5162_s15 = sld [smem:[#allocation22_spill]] }
 0x976   : > { %s2360_s2 = sand.u32 1, %s5160_s12   ;;  %p5163_p0 = scmp.ne.s32.totalorder %s5161_s22, 0 }
 0x977   : > { %p5164_p7 = scmp.ge.s32.totalorder %s5162_s15, 2  ;;  %s2361_s0 = scalar_lea.sflag [#allocation15], %s2360_s2 }
 0x979   : > { %p3653_p13 = pnand %p5164_p7, %p5163_p0 }
 0x97b   : > { %4077 = dma.done.wait (!%p3653_p13), %s2361_s0, 128  }
 0x97c   : > { %4079 = vsyncadd (!%p3653_p13), %s2361_s0, 4294967168  ;;  %s24_s29 = sadd.s32 1, %s5162_s15   ;;  %s5165_s16 = sld [smem:[#allocation26_spill]] }
 0x97d   : > { %p21_p10 = scmp.ge.s32.totalorder %s24_s29, 4   ;;  %s5166_s30 = sld [smem:[#allocation25_spill]] }
 0x97e   : > { %s5167_s24 = smov %s4086_s25  ;;  %s5168_s25 = smov %s4090_s26 }
 0x97f   : > { %s5170_s27 = smov %s4098_s28  ;;  %23 = sbr.rel (!%p21_p10) target bundleno = 11 (0xb), region = 158 }
 0x982   : > { %s5169_s26 = smov %s5165_s16 }
 0x983   : > { %s5171_s28 = smov %s5166_s30 }
 0x986   :  { %2366 = vsyncpa [#allocation5], 1 }
 0x987   :  { %2368 = vsyncpa [#allocation5 + $0x1], 1 }
 0x988   :  { %2369 = vsyncpa [#allocation8], 1 }
 0x989   :  { %2370 = vsyncpa [#allocation6], 1 }
 0x98a   :  { %2372 = vsyncpa [#allocation6 + $0x1], 1 }
 0x98b   :  { %2373 = vsyncpa [#allocation15], 1 }
 0x98c   :  { %2375 = vsyncpa [#allocation15 + $0x1], 1 }

</bundles_post_ra>
